<compile_context>
chip_gen: v5e
topology: v5e:2x2
jax: 0.10.0
libtpu: 0.0.40
codegen_flags: <defaults>
</compile_context>

<pallas_src>
import functools

import jax
import jax.numpy as jnp
from jax.experimental import pallas as pl
from jax.experimental.pallas import tpu as pltpu

# Small example config consistent with the module.
R = 3          # num_relations
N = 128        # num nodes (src == dst in the block)
IN_DIM = 32
OUT_DIM = 32
DIM_A = 16


# ----------------------------- Pallas kernel --------------------------------

def _mux_gnn_fused_kernel(adj_ref, x_ref, w_ref, b_ref, ws1_ref, ws2_ref,
                          out_ref, attn_ref):
    """Single-program fused GCN + semantic attention.

    adj_ref  : (R, N, N)    normalized adjacencies A_hat (matmul dtype)
    x_ref    : (N, IN)      node features (matmul dtype)
    w_ref    : (IN, OUT)    GraphConv weight (matmul dtype)
    b_ref    : (1, OUT)     GraphConv bias (f32)
    ws1_ref  : (R, OUT, A)  semantic attention W_s1 (f32)
    ws2_ref  : (R, 1, A)    semantic attention W_s2 transposed (f32)
    out_ref  : (N, OUT)     combined output (f32)
    attn_ref : (N, R)       softmax attention, column layout (f32)
    """
    nrel, nnode, _ = adj_ref.shape
    dout = w_ref.shape[1]

    # Shared projection X @ W (hoisted; A (X W) == (A X) W).  f32 accumulate,
    # then cast back to the MXU operand dtype for the big adjacency matmul.
    xw = jnp.dot(x_ref[...], w_ref[...], preferred_element_type=jnp.float32)
    xw_m = xw.astype(adj_ref.dtype)

    # All R GraphConvs in ONE MXU call: (R*N, N) @ (N, OUT), f32 accumulate.
    adj_flat = jnp.reshape(adj_ref[...], (nrel * nnode, nnode))
    h_flat = jnp.dot(adj_flat, xw_m, preferred_element_type=jnp.float32)
    h_flat = jnp.maximum(h_flat + b_ref[...], 0.0)          # bias + relu

    # Per-relation semantic-attention logits, kept as (N, 1) columns:
    #   score[r, n] = sum_a tanh(h[r] @ Ws1[r])[n, a] * Ws2[r, a]
    h_rel = []
    score_cols = []
    for r in range(nrel):                                    # R=3, unrolled
        h_r = h_flat[r * nnode:(r + 1) * nnode, :]           # static slice
        h_rel.append(h_r)
        s1 = jnp.tanh(jnp.dot(h_r, ws1_ref[r],
                              preferred_element_type=jnp.float32))  # (N, A)
        score_cols.append(jnp.sum(s1 * ws2_ref[r], axis=-1,
                                  keepdims=True))            # (N, 1)

    # Softmax over relations, element-wise across the R columns (no transpose,
    # no dynamic stores).  dropout(p=0.0) on attention is identity.
    m = score_cols[0]
    for c in score_cols[1:]:
        m = jnp.maximum(m, c)
    exps = [jnp.exp(c - m) for c in score_cols]
    denom = exps[0]
    for e in exps[1:]:
        denom = denom + e
    attn_cols = [e / denom for e in exps]                    # each (N, 1)

    # Weighted combine: out[n, :] = sum_r attn[r, n] * h[r, n, :]
    acc = attn_cols[0] * h_rel[0]
    for r in range(1, nrel):
        acc = acc + attn_cols[r] * h_rel[r]
    out_ref[...] = acc.astype(out_ref.dtype)

    # Attention written once, in column layout (N, R); the wrapper transposes
    # the tiny (N, 3) array to the public (R, N) shape.
    attn_ref[...] = jnp.concatenate(attn_cols, axis=-1).astype(attn_ref.dtype)


# ------------------------------ JAX wrapper ---------------------------------

@functools.partial(jax.jit, static_argnames=("matmul_dtype",))
def mux_gnn_layer(adj_norm, x, w_gcn, b_gcn, w_s1, w_s2, *,
                  matmul_dtype=jnp.bfloat16):
    r, n, _ = adj_norm.shape
    din = x.shape[1]
    dout = w_gcn.shape[1]
    da = w_s1.shape[2]

    # MXU operands in bf16 (v5e/v6e/v7x rate), f32 accumulation in-kernel.
    adj_m = adj_norm.astype(matmul_dtype)
    x_m = x.astype(matmul_dtype)
    w_m = w_gcn.astype(matmul_dtype)
    # Small residents / elementwise params stay f32.
    b2 = b_gcn.reshape(1, dout).astype(jnp.float32)
    ws1 = w_s1.astype(jnp.float32)
    ws2_t = jnp.swapaxes(w_s2, 1, 2).astype(jnp.float32)     # (R, 1, A)

    mm_bytes = jnp.dtype(matmul_dtype).itemsize
    cost = pl.CostEstimate(
        flops=int(2 * n * din * dout                       # X @ W
                  + 2 * r * n * n * dout                   # stacked adjacency matmul
                  + r * (2 * n * dout * da + 2 * n * da)   # semantic attention
                  + r * n * (2 + 2 * dout)),               # softmax + combine
        transcendentals=int(r * n * (da + 1)),              # tanh + exp
        bytes_accessed=int((r * n * n + n * din + din * dout) * mm_bytes
                           + (dout + r * dout * da + r * da) * 4
                           + (n * dout + r * n) * 4),
    )

    # Grid-less call: the whole problem is VMEM-resident (~200 KB), so a
    # single program with full-array blocks is optimal (no per-step overhead).
    out, attn_nr = pl.pallas_call(
        _mux_gnn_fused_kernel,
        out_shape=(
            jax.ShapeDtypeStruct((n, dout), jnp.float32),
            jax.ShapeDtypeStruct((n, r), jnp.float32),       # column layout
        ),
        compiler_params=pltpu.CompilerParams(
            vmem_limit_bytes=32 * 1024 * 1024,               # safe on all gens
        ),
        cost_estimate=cost,
    )(adj_m, x_m, w_m, b2, ws1, ws2_t)

    # Public attention shape is (R, N); transpose of a (N, 3) array is trivial.
    return out, attn_nr.T


# ------------------------------ Param setup ---------------------------------

def xavier_uniform(key, shape, gain=1.0):
    if len(shape) == 2:
        fan_in, fan_out = shape
    else:
        rf = 1
        for d in shape[2:]:
            rf *= d
        fan_in, fan_out = shape[1] * rf, shape[0] * rf
    bound = gain * (6.0 / (fan_in + fan_out)) ** 0.5
    return jax.random.uniform(key, shape, jnp.float32, -bound, bound)


def build_normalized_adjacency(key, r, n, p=0.1):
    """A[r, dst, src] in {0,1};  A_hat = D_in^{-1/2} A D_out^{-1/2} (deg clamp 1)."""
    a = jax.random.bernoulli(key, p, (r, n, n)).astype(jnp.float32)
    deg_in = jnp.clip(a.sum(axis=2), 1.0, None)     # in-degree of dst
    deg_out = jnp.clip(a.sum(axis=1), 1.0, None)    # out-degree of src
    return a * (deg_in ** -0.5)[:, :, None] * (deg_out ** -0.5)[:, None, :]


# --------------------------------- Main --------------------------------------

if __name__ == "__main__":
    key = jax.random.PRNGKey(0)
    k_adj, k_x, k_w, k_s1, k_s2 = jax.random.split(key, 5)

    adj_norm = build_normalized_adjacency(k_adj, R, N)
    x = jax.random.normal(k_x, (N, IN_DIM), jnp.float32)

    # GraphConv params: xavier_uniform weight, zero bias (DGL defaults).
    w_gcn = xavier_uniform(k_w, (IN_DIM, OUT_DIM))
    b_gcn = jnp.zeros((OUT_DIM,), jnp.float32)
    # SemanticAttentionEinsum params.
    w_s1 = xavier_uniform(k_s1, (R, OUT_DIM, DIM_A), gain=5.0 / 3.0)  # tanh gain
    w_s2 = xavier_uniform(k_s2, (R, DIM_A, 1))

    # Pure-JAX f32 reference.
    h_exp = jnp.maximum(
        jnp.einsum('rij,jk,kl->ril', adj_norm, x, w_gcn) + b_gcn, 0.0)
    sc_exp = jnp.einsum(
        'rna,rao->rno', jnp.tanh(jnp.einsum('rnd,rda->rna', h_exp, w_s1)), w_s2)
    attn_exp = jax.nn.softmax(sc_exp, axis=0)[..., 0]
    out_exp = jnp.einsum('rn,rnd->nd', attn_exp, h_exp)

    # 1) f32 MXU path: tight semantic check.
    out32, attn32 = jax.block_until_ready(
        mux_gnn_layer(adj_norm, x, w_gcn, b_gcn, w_s1, w_s2,
                      matmul_dtype=jnp.float32))
    assert out32.shape == (N, OUT_DIM) and attn32.shape == (R, N)
    assert jnp.allclose(out32, out_exp, rtol=1e-2, atol=1e-3)
    assert jnp.allclose(attn32, attn_exp, rtol=1e-2, atol=1e-3)

    # 2) bf16 MXU path (recommended perf config on v5e/v6e/v7x): bf16-precision
    #    sanity check against the f32 reference.
    out16, attn16 = jax.block_until_ready(
        mux_gnn_layer(adj_norm, x, w_gcn, b_gcn, w_s1, w_s2,
                      matmul_dtype=jnp.bfloat16))
    assert out16.shape == (N, OUT_DIM) and attn16.shape == (R, N)
    assert jnp.allclose(out16, out_exp, rtol=5e-2, atol=5e-2)
    assert jnp.allclose(attn16, attn_exp, rtol=5e-2, atol=5e-2)

    # TODO(synk): sparse DGL edge-list message passing has no clean Pallas
    # equivalent here; it is represented as a dense pre-normalized adjacency
    # matmul, which is mathematically exact for GraphConv(norm='both').
    print("KERNEL_OK")
</pallas_src>

<mosaic_0001>
module attributes {stable_mosaic.version = 11 : i64} {
  func.func @_mux_gnn_fused_kernel(%arg0: memref<3x128x128xf32, #tpu.memory_space<vmem>>, %arg1: memref<128x32xf32, #tpu.memory_space<vmem>>, %arg2: memref<32x32xf32, #tpu.memory_space<vmem>>, %arg3: memref<1x32xf32, #tpu.memory_space<vmem>>, %arg4: memref<3x32x16xf32, #tpu.memory_space<vmem>>, %arg5: memref<3x1x16xf32, #tpu.memory_space<vmem>>, %arg6: memref<128x32xf32, #tpu.memory_space<vmem>>, %arg7: memref<128x3xf32, #tpu.memory_space<vmem>>) attributes {dimension_semantics = [], scalar_prefetch = 0 : i64, scratch_operands = 0 : i64, tpu.core_type = #tpu.core_type<tc>} {
    %c0 = arith.constant 0 : index
    %c0_0 = arith.constant 0 : index
    %0 = vector.load %arg1[%c0, %c0_0] : memref<128x32xf32, #tpu.memory_space<vmem>>, vector<128x32xf32>
    %c0_1 = arith.constant 0 : index
    %c0_2 = arith.constant 0 : index
    %1 = vector.load %arg2[%c0_1, %c0_2] : memref<32x32xf32, #tpu.memory_space<vmem>>, vector<32x32xf32>
    %cst = arith.constant dense<0.000000e+00> : vector<128x32xf32>
    %2 = tpu.matmul %0, %1, %cst {dimension_numbers = #tpu.dot_dimension_numbers<[1], [0], [0], [1], [0, 0, 1, 1], [], []>} : vector<128x32xf32>, vector<32x32xf32>, vector<128x32xf32> -> vector<128x32xf32>
    %c0_3 = arith.constant 0 : index
    %c0_4 = arith.constant 0 : index
    %c0_5 = arith.constant 0 : index
    %3 = vector.load %arg0[%c0_3, %c0_4, %c0_5] : memref<3x128x128xf32, #tpu.memory_space<vmem>>, vector<3x128x128xf32>
    %4 = vector.shape_cast %3 : vector<3x128x128xf32> to vector<384x128xf32>
    %cst_6 = arith.constant dense<0.000000e+00> : vector<384x32xf32>
    %5 = tpu.matmul %4, %2, %cst_6 {dimension_numbers = #tpu.dot_dimension_numbers<[1], [0], [0], [1], [0, 0, 1, 1], [], []>} : vector<384x128xf32>, vector<128x32xf32>, vector<384x32xf32> -> vector<384x32xf32>
    %c0_7 = arith.constant 0 : index
    %c0_8 = arith.constant 0 : index
    %6 = vector.load %arg3[%c0_7, %c0_8] : memref<1x32xf32, #tpu.memory_space<vmem>>, vector<1x32xf32>
    %7 = vector.broadcast %6 : vector<1x32xf32> to vector<384x32xf32>
    %8 = arith.addf %5, %7 : vector<384x32xf32>
    %cst_9 = arith.constant 0.000000e+00 : f32
    %9 = vector.broadcast %cst_9 : f32 to vector<384x32xf32>
    %10 = arith.maximumf %8, %9 : vector<384x32xf32>
    %11 = vector.extract_strided_slice %10 {offsets = [0, 0], sizes = [128, 32], strides = [1, 1]} : vector<384x32xf32> to vector<128x32xf32>
    %c0_10 = arith.constant 0 : index
    %c0_11 = arith.constant 0 : index
    %c0_12 = arith.constant 0 : index
    %12 = vector.load %arg4[%c0_10, %c0_11, %c0_12] : memref<3x32x16xf32, #tpu.memory_space<vmem>>, vector<1x32x16xf32>
    %13 = vector.shape_cast %12 : vector<1x32x16xf32> to vector<32x16xf32>
    %cst_13 = arith.constant dense<0.000000e+00> : vector<128x16xf32>
    %14 = tpu.matmul %11, %13, %cst_13 {dimension_numbers = #tpu.dot_dimension_numbers<[1], [0], [0], [1], [0, 0, 1, 1], [], []>} : vector<128x32xf32>, vector<32x16xf32>, vector<128x16xf32> -> vector<128x16xf32>
    %15 = math.tanh %14 : vector<128x16xf32>
    %c0_14 = arith.constant 0 : index
    %c0_15 = arith.constant 0 : index
    %c0_16 = arith.constant 0 : index
    %16 = vector.load %arg5[%c0_14, %c0_15, %c0_16] : memref<3x1x16xf32, #tpu.memory_space<vmem>>, vector<1x1x16xf32>
    %17 = vector.shape_cast %16 : vector<1x1x16xf32> to vector<1x16xf32>
    %18 = vector.broadcast %17 : vector<1x16xf32> to vector<128x16xf32>
    %19 = arith.mulf %15, %18 : vector<128x16xf32>
    %cst_17 = arith.constant dense<0.000000e+00> : vector<128xf32>
    %20 = vector.multi_reduction <add>, %19, %cst_17 [1] : vector<128x16xf32> to vector<128xf32>
    %21 = vector.shape_cast %20 : vector<128xf32> to vector<128x1xf32>
    %22 = vector.extract_strided_slice %10 {offsets = [128, 0], sizes = [128, 32], strides = [1, 1]} : vector<384x32xf32> to vector<128x32xf32>
    %c1 = arith.constant 1 : index
    %c0_18 = arith.constant 0 : index
    %c0_19 = arith.constant 0 : index
    %23 = vector.load %arg4[%c1, %c0_18, %c0_19] : memref<3x32x16xf32, #tpu.memory_space<vmem>>, vector<1x32x16xf32>
    %24 = vector.shape_cast %23 : vector<1x32x16xf32> to vector<32x16xf32>
    %cst_20 = arith.constant dense<0.000000e+00> : vector<128x16xf32>
    %25 = tpu.matmul %22, %24, %cst_20 {dimension_numbers = #tpu.dot_dimension_numbers<[1], [0], [0], [1], [0, 0, 1, 1], [], []>} : vector<128x32xf32>, vector<32x16xf32>, vector<128x16xf32> -> vector<128x16xf32>
    %26 = math.tanh %25 : vector<128x16xf32>
    %c1_21 = arith.constant 1 : index
    %c0_22 = arith.constant 0 : index
    %c0_23 = arith.constant 0 : index
    %27 = vector.load %arg5[%c1_21, %c0_22, %c0_23] : memref<3x1x16xf32, #tpu.memory_space<vmem>>, vector<1x1x16xf32>
    %28 = vector.shape_cast %27 : vector<1x1x16xf32> to vector<1x16xf32>
    %29 = vector.broadcast %28 : vector<1x16xf32> to vector<128x16xf32>
    %30 = arith.mulf %26, %29 : vector<128x16xf32>
    %cst_24 = arith.constant dense<0.000000e+00> : vector<128xf32>
    %31 = vector.multi_reduction <add>, %30, %cst_24 [1] : vector<128x16xf32> to vector<128xf32>
    %32 = vector.shape_cast %31 : vector<128xf32> to vector<128x1xf32>
    %33 = vector.extract_strided_slice %10 {offsets = [256, 0], sizes = [128, 32], strides = [1, 1]} : vector<384x32xf32> to vector<128x32xf32>
    %c2 = arith.constant 2 : index
    %c0_25 = arith.constant 0 : index
    %c0_26 = arith.constant 0 : index
    %34 = vector.load %arg4[%c2, %c0_25, %c0_26] : memref<3x32x16xf32, #tpu.memory_space<vmem>>, vector<1x32x16xf32>
    %35 = vector.shape_cast %34 : vector<1x32x16xf32> to vector<32x16xf32>
    %cst_27 = arith.constant dense<0.000000e+00> : vector<128x16xf32>
    %36 = tpu.matmul %33, %35, %cst_27 {dimension_numbers = #tpu.dot_dimension_numbers<[1], [0], [0], [1], [0, 0, 1, 1], [], []>} : vector<128x32xf32>, vector<32x16xf32>, vector<128x16xf32> -> vector<128x16xf32>
    %37 = math.tanh %36 : vector<128x16xf32>
    %c2_28 = arith.constant 2 : index
    %c0_29 = arith.constant 0 : index
    %c0_30 = arith.constant 0 : index
    %38 = vector.load %arg5[%c2_28, %c0_29, %c0_30] : memref<3x1x16xf32, #tpu.memory_space<vmem>>, vector<1x1x16xf32>
    %39 = vector.shape_cast %38 : vector<1x1x16xf32> to vector<1x16xf32>
    %40 = vector.broadcast %39 : vector<1x16xf32> to vector<128x16xf32>
    %41 = arith.mulf %37, %40 : vector<128x16xf32>
    %cst_31 = arith.constant dense<0.000000e+00> : vector<128xf32>
    %42 = vector.multi_reduction <add>, %41, %cst_31 [1] : vector<128x16xf32> to vector<128xf32>
    %43 = vector.shape_cast %42 : vector<128xf32> to vector<128x1xf32>
    %44 = arith.maximumf %21, %32 : vector<128x1xf32>
    %45 = arith.maximumf %44, %43 : vector<128x1xf32>
    %46 = arith.subf %21, %45 : vector<128x1xf32>
    %47 = math.exp %46 : vector<128x1xf32>
    %48 = arith.subf %32, %45 : vector<128x1xf32>
    %49 = math.exp %48 : vector<128x1xf32>
    %50 = arith.subf %43, %45 : vector<128x1xf32>
    %51 = math.exp %50 : vector<128x1xf32>
    %52 = arith.addf %47, %49 : vector<128x1xf32>
    %53 = arith.addf %52, %51 : vector<128x1xf32>
    %54 = arith.divf %47, %53 : vector<128x1xf32>
    %55 = arith.divf %49, %53 : vector<128x1xf32>
    %56 = arith.divf %51, %53 : vector<128x1xf32>
    %57 = vector.broadcast %54 : vector<128x1xf32> to vector<128x32xf32>
    %58 = arith.mulf %57, %11 : vector<128x32xf32>
    %59 = vector.broadcast %55 : vector<128x1xf32> to vector<128x32xf32>
    %60 = arith.mulf %59, %22 : vector<128x32xf32>
    %61 = arith.addf %58, %60 : vector<128x32xf32>
    %62 = vector.broadcast %56 : vector<128x1xf32> to vector<128x32xf32>
    %63 = arith.mulf %62, %33 : vector<128x32xf32>
    %64 = arith.addf %61, %63 : vector<128x32xf32>
    %c0_32 = arith.constant 0 : index
    %c0_33 = arith.constant 0 : index
    %65 = vector.load %arg6[%c0_32, %c0_33] : memref<128x32xf32, #tpu.memory_space<vmem>>, vector<128x32xf32>
    tpu.vector_store %arg6[%c0_32, %c0_33], %64 {strides = array<i32>} : memref<128x32xf32, #tpu.memory_space<vmem>>, vector<128x32xf32>,
    %66 = tpu.concatenate %54, %55, %56 in 1 : vector<128x1xf32>, vector<128x1xf32>, vector<128x1xf32> -> vector<128x3xf32>
    %c0_34 = arith.constant 0 : index
    %c0_35 = arith.constant 0 : index
    %67 = vector.load %arg7[%c0_34, %c0_35] : memref<128x3xf32, #tpu.memory_space<vmem>>, vector<128x3xf32>
    tpu.vector_store %arg7[%c0_34, %c0_35], %66 {strides = array<i32>} : memref<128x3xf32, #tpu.memory_space<vmem>>, vector<128x3xf32>,
    return
  }
}

</mosaic_0001>

<bundles_post_ra>
// kernel: mux_gnn_layer.1
= control target key start
LH: loop header
LB: loop body
LE: loop exit
PB: predicated region body
PF: predicated region fallthrough
CT: control target
= control target key end

     0   :  { %13 = vsyncpa [#allocation3], 0  ;;  %s2035_s27 = smov [#allocation2]   ;;  %s2036_s29 = smov 128   ;;  %s3418_s0 = inlined_call_operand.hbm [shape: f32[3,128,128], index: 0, kind: input, shape index: {}]   ;;  %s3419_s1 = inlined_call_operand.vmem [shape: f32[128,32], index: 1, kind: input, shape index: {}]   ;;  %s3420_s2 = inlined_call_operand.vmem [shape: f32[32,32], index: 2, kind: input, shape index: {}]   ;;  %s3421_s3 = inlined_call_operand.vmem [shape: f32[1,32], index: 3, kind: input, shape index: {}]   ;;  %s3422_s4 = inlined_call_operand.vmem [shape: f32[3,32,16], index: 4, kind: input, shape index: {}]   ;;  %s3423_s5 = inlined_call_operand.vmem [shape: f32[3,1,16], index: 5, kind: input, shape index: {}]   ;;  %s3424_s6 = inlined_call_operand.vmem [shape: f32[128,32], index: 6, kind: output, shape index: {0}]   ;;  %s3425_s7 = inlined_call_operand.vmem [shape: f32[128,3], index: 7, kind: output, shape index: {1}]  }
   0x1   :  { %s18_s26 = sshll.u32 %s3418_s0, 4  ;;  %s20_s28 = sshll.u32 %s2035_s27, 4  ;;  %s19_s26 = int_to_ptr.hbm [resolvable:$true] %s18_s26  ;;  %s21_s28 = int_to_ptr.vmem [resolvable:$true] %s20_s28 }
   0x2   :  { %s2037_s30 = smov 8  }
   0x3   :  { %26 = dma.hbm_to_vmem [thread:$0]  %s19_s26, 6144, %s21_s28, [#allocation3], %s2036_s29, %s2036_s29, %s2037_s30  }
   0x4   :  { %2033 = dma.done.wait [#allocation3], 6144  }
   0x5   :  { %2034 = vsyncadd [#allocation3], 4294961152  ;;  %v60_v0 = vld [vmem:[%s3420_s2 + $0x18] sm:$0xff]  ;;  %v59_v1 = vld [vmem:[%s3420_s2 + $0x10] sm:$0xff]  ;;  %vm61_vm0 = vcmask 261120   ;;  %vm589_vm1 = vcmask 130048  }
   0x6   :  { %122 = vmatpush.msra.mxu0 %v60_v0  ;;  %1754 = vmatpush.msra.mxu3 %v60_v0  ;;  %v58_v2 = vld [vmem:[%s3420_s2 + $0x8] sm:$0xff]  ;;  %v57_v3 = vld [vmem:[%s3420_s2] sm:$0xff]  ;;  %v43_v6 = vld [vmem:[%s3419_s1 + $0x10] sm:$0xff]  ;;  %vm1620_vm3 = vcmask 7168   ;;  %vm1637_vm4 = vcmask 15360   ;;  %vm1654_vm8 = vcmask 23552  }
   0x7   :  { %v41_v4 = vld [vmem:[%s3419_s1] sm:$0xff]  ;;  %v42_v5 = vld [vmem:[%s3419_s1 + $0x8] sm:$0xff]  ;;  %v44_v7 = vld [vmem:[%s3419_s1 + $0x18] sm:$0xff] }
   0x8   :  { %123 = vmatpush.msra.mxu0 %v59_v1  ;;  %1755 = vmatpush.msra.mxu3 %v59_v1  ;;  %v45_v8 = vld [vmem:[%s3419_s1 + $0x20] sm:$0xff]  ;;  %v46_v9 = vld [vmem:[%s3419_s1 + $0x28] sm:$0xff]  ;;  %v55_v10 = vld [vmem:[%s3419_s1 + $0x70] sm:$0xff] }
   0x9   :  { %v47_v11 = vld [vmem:[%s3419_s1 + $0x30] sm:$0xff]  ;;  %v56_v12 = vld [vmem:[%s3419_s1 + $0x78] sm:$0xff]  ;;  %v49_v14 = vld [vmem:[%s3419_s1 + $0x40] sm:$0xff] }
   0xa   :  { %124 = vmatpush.msra.mxu0 %v58_v2  ;;  %1756 = vmatpush.msra.mxu3 %v58_v2  ;;  %v48_v13 = vld [vmem:[%s3419_s1 + $0x38] sm:$0xff]  ;;  %v50_v15 = vld [vmem:[%s3419_s1 + $0x48] sm:$0xff]  ;;  %v51_v16 = vld [vmem:[%s3419_s1 + $0x50] sm:$0xff] }
   0xb   :  { %v52_v17 = vld [vmem:[%s3419_s1 + $0x58] sm:$0xff]  ;;  %v53_v18 = vld [vmem:[%s3419_s1 + $0x60] sm:$0xff]  ;;  %v54_v19 = vld [vmem:[%s3419_s1 + $0x68] sm:$0xff] }
   0xc   :  { %125 = vmatpush.msra.mxu0 %v57_v3  ;;  %1757 = vmatpush.msra.mxu3 %v57_v3  ;;  %v175_v36 = vld [vmem:[#allocation2] sm:$0xff]  ;;  %v202_v37 = vld [vmem:[#allocation2 + $0xd8] sm:$0xff]  ;;  %v176_v38 = vld [vmem:[#allocation2 + $0x8] sm:$0xff] }
   0xd   :  { %1680 = vmatmul.msk.f32.vlgmr.msra.gmra.mxu0 %vm61_vm0, %v41_v4  ;;  %1694 = vmatmul.msk.f32.vlgmr.msra.gmra.mxu3 %vm61_vm0, %v55_v10  ;;  %v203_v39 = vld [vmem:[#allocation2 + $0xe0] sm:$0xff]  ;;  %v177_v40 = vld [vmem:[#allocation2 + $0x10] sm:$0xff]  ;;  %v204_v41 = vld [vmem:[#allocation2 + $0xe8] sm:$0xff] }
   0xe   :  { %v178_v42 = vld [vmem:[#allocation2 + $0x18] sm:$0xff]  ;;  %v205_v43 = vld [vmem:[#allocation2 + $0xf0] sm:$0xff]  ;;  %v179_v44 = vld [vmem:[#allocation2 + $0x20] sm:$0xff] }
   0xf   :  { %v206_v45 = vld [vmem:[#allocation2 + $0xf8] sm:$0xff]  ;;  %v180_v46 = vld [vmem:[#allocation2 + $0x28] sm:$0xff]  ;;  %v207_v47 = vld [vmem:[#allocation2 + $0x100] sm:$0xff] }
  0x10   :  { %v181_v48 = vld [vmem:[#allocation2 + $0x30] sm:$0xff]  ;;  %v208_v49 = vld [vmem:[#allocation2 + $0x108] sm:$0xff]  ;;  %v439_v50 = vld [vmem:[%s3422_s4 + $0x18] sm:$0xff] }
  0x11   :  { %1774 = vmatpush.msrb.mxu3 %v439_v50  ;;  %v182_v51 = vld [vmem:[#allocation2 + $0x38] sm:$0xff]  ;;  %v209_v52 = vld [vmem:[#allocation2 + $0x110] sm:$0xff]  ;;  %v183_v53 = vld [vmem:[#allocation2 + $0x40] sm:$0xff] }
  0x12   :  { %v210_v54 = vld [vmem:[#allocation2 + $0x118] sm:$0xff]  ;;  %v184_v55 = vld [vmem:[#allocation2 + $0x48] sm:$0xff]  ;;  %v211_v56 = vld [vmem:[#allocation2 + $0x120] sm:$0xff] }
  0x13   :  { %v185_v57 = vld [vmem:[#allocation2 + $0x50] sm:$0xff]  ;;  %v212_v58 = vld [vmem:[#allocation2 + $0x128] sm:$0xff]  ;;  %v186_v59 = vld [vmem:[#allocation2 + $0x58] sm:$0xff] }
  0x14   :  { %v213_v60 = vld [vmem:[#allocation2 + $0x130] sm:$0xff]  ;;  %v187_v62 = vld [vmem:[#allocation2 + $0x60] sm:$0xff]  ;;  %v214_v63 = vld [vmem:[#allocation2 + $0x138] sm:$0xff] }
  0x15   :  { %1681 = vmatmul.msk.f32.gmra.mxu0 %vm61_vm0, %v42_v5  ;;  %1695 = vmatmul.msk.f32.gmra.mxu3 %vm61_vm0, %v56_v12  ;;  %v438_v61 = vld [vmem:[%s3422_s4 + $0x10] sm:$0xff]  ;;  %v188_v0 = vld [vmem:[#allocation2 + $0x68] sm:$0xff]  ;;  %v215_v1 = vld [vmem:[#allocation2 + $0x140] sm:$0xff] }
  0x16   :  { %1775 = vmatpush.msrb.mxu3 %v438_v61  ;;  %v189_v2 = vld [vmem:[#allocation2 + $0x70] sm:$0xff]  ;;  %v216_v3 = vld [vmem:[#allocation2 + $0x148] sm:$0xff]  ;;  %v1736_v4 = vld [vmem:[%s3422_s4 + $0x58] sm:$0xff] }
  0x17   :  { %906 = vmatpush.msrb.mxu0 %v1736_v4  ;;  %v190_v5 = vld [vmem:[#allocation2 + $0x78] sm:$0xff] }
  0x1d   :  { %1682 = vmatmul.msk.f32.gmra.mxu0 %vm61_vm0, %v43_v6  ;;  %v217_v6 = vld [vmem:[#allocation2 + $0x150] sm:$0xff] }
  0x25   :  { %1683 = vmatmul.msk.f32.gmra.mxu0 %vm61_vm0, %v44_v7 }
  0x2d   :  { %1684 = vmatmul.msk.f32.gmra.mxu0 %vm61_vm0, %v45_v8  ;;  %v191_v8 = vld [vmem:[#allocation2 + $0x80] sm:$0xff] }
  0x35   :  { %1685 = vmatmul.msk.f32.gmra.mxu0 %vm61_vm0, %v46_v9  ;;  %v218_v9 = vld [vmem:[#allocation2 + $0x158] sm:$0xff] }
  0x3d   :  { %1686 = vmatmul.msk.f32.gmra.mxu0 %vm61_vm0, %v47_v11  ;;  %v437_v11 = vld [vmem:[%s3422_s4 + $0x8] sm:$0xff] }
  0x3e   :  { %1776 = vmatpush.msrb.mxu3 %v437_v11 }
  0x45   :  { %1687 = vmatmul.msk.f32.gmra.mxu0 %vm61_vm0, %v48_v13  ;;  %v192_v13 = vld [vmem:[#allocation2 + $0x88] sm:$0xff] }
  0x4d   :  { %1688 = vmatmul.msk.f32.gmra.mxu0 %vm61_vm0, %v49_v14  ;;  %v219_v14 = vld [vmem:[#allocation2 + $0x160] sm:$0xff] }
  0x55   :  { %1689 = vmatmul.msk.f32.gmra.mxu0 %vm61_vm0, %v50_v15  ;;  %v436_v15 = vld [vmem:[%s3422_s4] sm:$0xff] }
  0x56   :  { %1777 = vmatpush.msrb.mxu3 %v436_v15 }
  0x5d   :  { %1690 = vmatmul.msk.f32.gmra.mxu0 %vm61_vm0, %v51_v16 }
  0x65   :  { %1691 = vmatmul.msk.f32.gmra.mxu0 %vm61_vm0, %v52_v17 }
  0x6d   :  { %1692 = vmatmul.msk.f32.gmra.mxu0 %vm61_vm0, %v53_v18  ;;  %v193_v18 = vld [vmem:[#allocation2 + $0x90] sm:$0xff] }
  0x75   :  { %1693 = vmatmul.msk.f32.gmra.mxu0 %vm61_vm0, %v54_v19  ;;  %v220_v19 = vld [vmem:[#allocation2 + $0x168] sm:$0xff] }
  0x8a   :  { %v127_v20 = vpop.f32.mrf.mxu0 }
  0x90   :  { %v169_v27 = vpop.f32.mrf.mxu3 }
  0x92   :  { %v130_v21 = vpop.f32.mrf.mxu0 }
  0x98   :  { %v172_v29 = vpop.f32.mrf.mxu3 }
  0x99   :  { %227 = vmatpush.msra.mxu1 %v172_v29  ;;  %1758 = vmatpush.msra.mxu2 %v172_v29 }
  0x9a   :  { %v133_v22 = vpop.f32.mrf.mxu0 }
  0x9b   :  { %228 = vmatpush.msra.mxu1 %v169_v27  ;;  %1759 = vmatpush.msra.mxu2 %v169_v27  ;;  %v1733_v27 = vld [vmem:[%s3422_s4 + $0x40] sm:$0xff] }
  0xa2   :  { %v136_v23 = vpop.f32.mrf.mxu0 }
  0xaa   :  { %v139_v24 = vpop.f32.mrf.mxu0 }
  0xb2   :  { %v142_v25 = vpop.f32.mrf.mxu0 }
  0xba   :  { %v145_v26 = vpop.f32.mrf.mxu0 }
  0xc2   :  { %v148_v28 = vpop.f32.mrf.mxu0 }
  0xca   :  { %v151_v30 = vpop.f32.mrf.mxu0 }
  0xd2   :  { %v154_v31 = vpop.f32.mrf.mxu0 }
  0xda   :  { %v157_v32 = vpop.f32.mrf.mxu0 }
  0xe2   :  { %v160_v33 = vpop.f32.mrf.mxu0 }
  0xea   :  { %v163_v34 = vpop.f32.mrf.mxu0 }
  0xf2   :  { %v166_v35 = vpop.f32.mrf.mxu0 }
  0xf3   :  { %229 = vmatpush.msra.mxu1 %v166_v35  ;;  %1760 = vmatpush.msra.mxu2 %v166_v35 }
  0xf5   :  { %230 = vmatpush.msra.mxu1 %v163_v34  ;;  %1761 = vmatpush.msra.mxu2 %v163_v34 }
  0xf7   :  { %231 = vmatpush.msra.mxu1 %v160_v33  ;;  %1762 = vmatpush.msra.mxu2 %v160_v33 }
  0xf9   :  { %232 = vmatpush.msra.mxu1 %v157_v32  ;;  %1763 = vmatpush.msra.mxu2 %v157_v32  ;;  %v2195_v32 = vld [vmem:[%s3421_s3] ss:$0 sm:$0xff] }
  0xfb   :  { %233 = vmatpush.msra.mxu1 %v154_v31  ;;  %1764 = vmatpush.msra.mxu2 %v154_v31  ;;  %v222_v31 = vld [vmem:[#allocation2 + $0x178] sm:$0xff] }
  0xfd   :  { %234 = vmatpush.msra.mxu1 %v151_v30  ;;  %1765 = vmatpush.msra.mxu2 %v151_v30  ;;  %v195_v30 = vld [vmem:[#allocation2 + $0xa0] sm:$0xff] }
  0xff   :  { %235 = vmatpush.msra.mxu1 %v148_v28  ;;  %1766 = vmatpush.msra.mxu2 %v148_v28 }
 0x101   :  { %236 = vmatpush.msra.mxu1 %v145_v26  ;;  %1767 = vmatpush.msra.mxu2 %v145_v26  ;;  %v221_v26 = vld [vmem:[#allocation2 + $0x170] sm:$0xff] }
 0x103   :  { %237 = vmatpush.msra.mxu1 %v142_v25  ;;  %1768 = vmatpush.msra.mxu2 %v142_v25  ;;  %v194_v25 = vld [vmem:[#allocation2 + $0x98] sm:$0xff] }
 0x105   :  { %238 = vmatpush.msra.mxu1 %v139_v24  ;;  %1769 = vmatpush.msra.mxu2 %v139_v24 }
 0x107   :  { %239 = vmatpush.msra.mxu1 %v136_v23  ;;  %1770 = vmatpush.msra.mxu2 %v136_v23  ;;  %v1734_v23 = vld [vmem:[%s3422_s4 + $0x48] sm:$0xff] }
 0x109   :  { %240 = vmatpush.msra.mxu1 %v133_v22  ;;  %1771 = vmatpush.msra.mxu2 %v133_v22 }
 0x10b   :  { %241 = vmatpush.msra.mxu1 %v130_v21  ;;  %1772 = vmatpush.msra.mxu2 %v130_v21  ;;  %v1715_v21 = vld [vmem:[%s3422_s4 + $0x38] sm:$0xff] }
 0x10c   :  { %703 = vmatpush.msra.mxu3 %v1715_v21 }
 0x10d   :  { %242 = vmatpush.msra.mxu1 %v127_v20  ;;  %1773 = vmatpush.msra.mxu2 %v127_v20  ;;  %v1735_v20 = vld [vmem:[%s3422_s4 + $0x50] sm:$0xff] }
 0x10e   :  { %243 = vmatmul.f32.vlgmr.msra.gmra.mxu1 %v175_v36  ;;  %324 = vmatmul.f32.vlgmr.msra.gmra.mxu2 %v202_v37  ;;  %v196_v36 = vld [vmem:[#allocation2 + $0xa8] sm:$0xff] }
 0x10f   :  { %500 = vmatpush.msrb.mxu2 %v439_v50  ;;  %907 = vmatpush.msrb.mxu0 %v1735_v20 }
 0x111   :  { %501 = vmatpush.msrb.mxu2 %v438_v61  ;;  %908 = vmatpush.msrb.mxu0 %v1734_v23 }
 0x113   :  { %502 = vmatpush.msrb.mxu2 %v437_v11  ;;  %909 = vmatpush.msrb.mxu0 %v1733_v27 }
 0x115   :  { %503 = vmatpush.msrb.mxu2 %v436_v15 }
 0x116   :  { %246 = vmatmul.f32.gmra.mxu1 %v176_v38  ;;  %327 = vmatmul.f32.gmra.mxu2 %v203_v39  ;;  %v1714_v38 = vld [vmem:[%s3422_s4 + $0x30] sm:$0xff] }
 0x117   :  { %704 = vmatpush.msra.mxu3 %v1714_v38 }
 0x11e   :  { %249 = vmatmul.f32.gmra.mxu1 %v177_v40  ;;  %330 = vmatmul.f32.gmra.mxu2 %v204_v41 }
 0x126   :  { %252 = vmatmul.f32.gmra.mxu1 %v178_v42  ;;  %333 = vmatmul.f32.gmra.mxu2 %v205_v43  ;;  %v197_v43 = vld [vmem:[#allocation2 + $0xb0] sm:$0xff] }
 0x12e   :  { %255 = vmatmul.f32.gmra.mxu1 %v179_v44  ;;  %336 = vmatmul.f32.gmra.mxu2 %v206_v45 }
 0x136   :  { %258 = vmatmul.f32.gmra.mxu1 %v180_v46  ;;  %339 = vmatmul.f32.gmra.mxu2 %v207_v47 }
 0x13e   :  { %261 = vmatmul.f32.gmra.mxu1 %v181_v48  ;;  %342 = vmatmul.f32.gmra.mxu2 %v208_v49 }
 0x146   :  { %264 = vmatmul.f32.gmra.mxu1 %v182_v51  ;;  %345 = vmatmul.f32.gmra.mxu2 %v209_v52  ;;  %v198_v52 = vld [vmem:[#allocation2 + $0xb8] sm:$0xff] }
 0x14e   :  { %267 = vmatmul.f32.gmra.mxu1 %v183_v53  ;;  %348 = vmatmul.f32.gmra.mxu2 %v210_v54 }
 0x156   :  { %270 = vmatmul.f32.gmra.mxu1 %v184_v55  ;;  %351 = vmatmul.f32.gmra.mxu2 %v211_v56 }
 0x15e   :  { %273 = vmatmul.f32.gmra.mxu1 %v185_v57  ;;  %354 = vmatmul.f32.gmra.mxu2 %v212_v58  ;;  %v1713_v58 = vld [vmem:[%s3422_s4 + $0x28] sm:$0xff] }
 0x15f   :  { %705 = vmatpush.msra.mxu3 %v1713_v58 }
 0x166   :  { %276 = vmatmul.f32.gmra.mxu1 %v186_v59  ;;  %357 = vmatmul.f32.gmra.mxu2 %v213_v60 }
 0x16e   :  { %279 = vmatmul.f32.gmra.mxu1 %v187_v62  ;;  %360 = vmatmul.f32.gmra.mxu2 %v214_v63  ;;  %v199_v62 = vld [vmem:[#allocation2 + $0xc0] sm:$0xff] }
 0x176   :  { %282 = vmatmul.f32.gmra.mxu1 %v188_v0  ;;  %363 = vmatmul.f32.gmra.mxu2 %v215_v1 }
 0x17e   :  { %285 = vmatmul.f32.gmra.mxu1 %v189_v2  ;;  %366 = vmatmul.f32.gmra.mxu2 %v216_v3 }
 0x186   :  { %288 = vmatmul.f32.gmra.mxu1 %v190_v5  ;;  %369 = vmatmul.f32.gmra.mxu2 %v217_v6 }
 0x18b   :  { %v244_v7 = vpop.f32.mrf.mxu1 }
 0x18c   :  { %v2198_v33 = vadd.f32 %v2195_v32, %v244_v7  ;;  %v200_v7 = vld [vmem:[#allocation2 + $0xc8] sm:$0xff] }
 0x18e   :  { %291 = vmatmul.f32.gmra.mxu1 %v191_v8  ;;  %372 = vmatmul.f32.gmra.mxu2 %v218_v9  ;;  %v3466_v37 = vmax.f32 %v2198_v33, 0.0 }
 0x191   :  { %v2166_v10 = vpop.f32.mrf.mxu2 }
 0x193   :  { %v247_v12 = vpop.f32.mrf.mxu1 }
 0x194   :  { %v2210_v39 = vadd.f32 %v2195_v32, %v247_v12 }
 0x196   :  { %294 = vmatmul.f32.gmra.mxu1 %v192_v13  ;;  %375 = vmatmul.f32.gmra.mxu2 %v219_v14  ;;  %v3461_v44 = vmax.f32 %v2210_v39, 0.0 }
 0x199   :  { %v2174_v16 = vpop.f32.mrf.mxu2 }
 0x19b   :  { %v250_v17 = vpop.f32.mrf.mxu1 }
 0x19c   :  { %v2228_v48 = vadd.f32 %v2195_v32, %v250_v17 }
 0x19e   :  { %297 = vmatmul.f32.gmra.mxu1 %v193_v18  ;;  %378 = vmatmul.f32.gmra.mxu2 %v220_v19  ;;  %v3458_v53 = vmax.f32 %v2228_v48, 0.0  ;;  %v201_v18 = vld [vmem:[#allocation2 + $0xd0] sm:$0xff] }
 0x1a1   :  { %v2182_v22 = vpop.f32.mrf.mxu2 }
 0x1a3   :  { %v253_v24 = vpop.f32.mrf.mxu1 }
 0x1a4   :  { %v2249_v57 = vadd.f32 %v2195_v32, %v253_v24  ;;  %v1712_v24 = vld [vmem:[%s3422_s4 + $0x20] sm:$0xff] }
 0x1a5   :  { %706 = vmatpush.msra.mxu3 %v1712_v24 }
 0x1a6   :  { %300 = vmatmul.f32.gmra.mxu1 %v194_v25  ;;  %381 = vmatmul.f32.gmra.mxu2 %v221_v26  ;;  %v3454_v63 = vmax.f32 %v2249_v57, 0.0 }
 0x1a9   :  { %v2190_v28 = vpop.f32.mrf.mxu2 }
 0x1ab   :  { %v256_v29 = vpop.f32.mrf.mxu1 }
 0x1ac   :  { %v2273_v3 = vadd.f32 %v2195_v32, %v256_v29 }
 0x1ae   :  { %303 = vmatmul.f32.gmra.mxu1 %v195_v30  ;;  %384 = vmatmul.f32.gmra.mxu2 %v222_v31  ;;  %v3449_v8 = vmax.f32 %v2273_v3, 0.0 }
 0x1b1   :  { %v2200_v34 = vpop.f32.mrf.mxu2 }
 0x1b3   :  { %v259_v35 = vpop.f32.mrf.mxu1 }
 0x1b4   :  { %v2294_v13 = vadd.f32 %v2195_v32, %v259_v35 }
 0x1b6   :  { %306 = vmatmul.f32.gmra.mxu1 %v196_v36  ;;  %1696 = vmatmul.msk.f32.vlgmr.msrb.gmra.mxu2 %vm61_vm0, %v3466_v37  ;;  %v3445_v19 = vmax.f32 %v2294_v13, 0.0 }
 0x1b9   :  { %v340_v40 = vpop.f32.mrf.mxu2 }
 0x1ba   :  { %v2213_v41 = vadd.f32 %v2195_v32, %v340_v40 }
 0x1bb   :  { %v262_v42 = vpop.f32.mrf.mxu1 }
 0x1bc   :  { %v3463_v45 = vmax.f32 %v2213_v41, 0.0  ;;  %v2218_v46 = vadd.f32 %v2195_v32, %v262_v42 }
 0x1be   :  { %v3443_v47 = vmax.f32 %v2218_v46, 0.0  ;;  %309 = vmatmul.f32.gmra.mxu1 %v197_v43  ;;  %1697 = vmatmul.msk.f32.gmra.mxu2 %vm61_vm0, %v3461_v44 }
 0x1bf   :  { %1737 = vmatmul.msk.f32.vlgmr.msrb.gmra.mxu0 %vm61_vm0, %v3463_v45 }
 0x1c0   :  { %1702 = vmatmul.msk.f32.vlgmr.msrb.gmra.mxu3 %vm61_vm0, %v3443_v47 }
 0x1c1   :  { %v343_v49 = vpop.f32.mrf.mxu2 }
 0x1c2   :  { %v2234_v50 = vadd.f32 %v2195_v32, %v343_v49 }
 0x1c3   :  { %v265_v51 = vpop.f32.mrf.mxu1 }
 0x1c4   :  { %v3459_v54 = vmax.f32 %v2234_v50, 0.0  ;;  %v2239_v55 = vadd.f32 %v2195_v32, %v265_v51 }
 0x1c6   :  { %3509 = vst [vmem:[#allocation5_spill] sm:$0xff] %v2239_v55  ;;  %v3440_v56 = vmax.f32 %v2239_v55, 0.0  ;;  %312 = vmatmul.f32.gmra.mxu1 %v198_v52  ;;  %1698 = vmatmul.msk.f32.gmra.mxu2 %vm61_vm0, %v3458_v53 }
 0x1c7   :  { %1738 = vmatmul.msk.f32.gmra.mxu0 %vm61_vm0, %v3459_v54 }
 0x1c8   :  { %1703 = vmatmul.msk.f32.gmra.mxu3 %vm61_vm0, %v3440_v56 }
 0x1c9   :  { %v346_v59 = vpop.f32.mrf.mxu2 }
 0x1ca   :  { %v2258_v60 = vadd.f32 %v2195_v32, %v346_v59 }
 0x1cb   :  { %v268_v61 = vpop.f32.mrf.mxu1 }
 0x1cc   :  { %v3455_v0 = vmax.f32 %v2258_v60, 0.0  ;;  %v2263_v1 = vadd.f32 %v2195_v32, %v268_v61 }
 0x1ce   :  { %3510 = vst [vmem:[#allocation6_spill] sm:$0xff] %v2263_v1  ;;  %v3437_v2 = vmax.f32 %v2263_v1, 0.0  ;;  %315 = vmatmul.f32.gmra.mxu1 %v199_v62  ;;  %1699 = vmatmul.msk.f32.gmra.mxu2 %vm61_vm0, %v3454_v63 }
 0x1cf   :  { %1739 = vmatmul.msk.f32.gmra.mxu0 %vm61_vm0, %v3455_v0 }
 0x1d0   :  { %1704 = vmatmul.msk.f32.gmra.mxu3 %vm61_vm0, %v3437_v2 }
 0x1d1   :  { %v349_v4 = vpop.f32.mrf.mxu2 }
 0x1d2   :  { %v2279_v5 = vadd.f32 %v2195_v32, %v349_v4 }
 0x1d3   :  { %v271_v6 = vpop.f32.mrf.mxu1 }
 0x1d4   :  { %v3452_v9 = vmax.f32 %v2279_v5, 0.0  ;;  %v2284_v11 = vadd.f32 %v2195_v32, %v271_v6 }
 0x1d6   :  { %3511 = vst [vmem:[#allocation7_spill] sm:$0xff] %v2284_v11  ;;  %v3435_v12 = vmax.f32 %v2284_v11, 0.0  ;;  %318 = vmatmul.f32.gmra.mxu1 %v200_v7  ;;  %1700 = vmatmul.msk.f32.gmra.mxu2 %vm61_vm0, %v3449_v8 }
 0x1d7   :  { %1740 = vmatmul.msk.f32.gmra.mxu0 %vm61_vm0, %v3452_v9 }
 0x1d8   :  { %1705 = vmatmul.msk.f32.gmra.mxu3 %vm61_vm0, %v3435_v12 }
 0x1d9   :  { %v352_v14 = vpop.f32.mrf.mxu2 }
 0x1da   :  { %v2300_v15 = vadd.f32 %v2195_v32, %v352_v14 }
 0x1db   :  { %v274_v17 = vpop.f32.mrf.mxu1 }
 0x1dc   :  { %v3447_v20 = vmax.f32 %v2300_v15, 0.0  ;;  %v2305_v21 = vadd.f32 %v2195_v32, %v274_v17 }
 0x1de   :  { %3512 = vst [vmem:[#allocation8_spill] sm:$0xff] %v2305_v21  ;;  %v3432_v23 = vmax.f32 %v2305_v21, 0.0  ;;  %321 = vmatmul.f32.gmra.mxu1 %v201_v18  ;;  %1701 = vmatmul.msk.f32.gmra.mxu2 %vm61_vm0, %v3445_v19 }
 0x1df   :  { %1741 = vmatmul.msk.f32.gmra.mxu0 %vm61_vm0, %v3447_v20 }
 0x1e0   :  { %1706 = vmatmul.msk.f32.gmra.mxu3 %vm61_vm0, %v3432_v23 }
 0x1e1   :  { %v355_v25 = vpop.f32.mrf.mxu2 }
 0x1e2   :  { %v2321_v26 = vadd.f32 %v2195_v32, %v355_v25 }
 0x1e3   :  { %v277_v27 = vpop.f32.mrf.mxu1 }
 0x1e4   :  { %v3444_v29 = vmax.f32 %v2321_v26, 0.0  ;;  %v2325_v30 = vadd.f32 %v2195_v32, %v277_v27 }
 0x1e6   :  { %3513 = vst [vmem:[#allocation9_spill] sm:$0xff] %v2325_v30  ;;  %v3430_v31 = vmax.f32 %v2325_v30, 0.0 }
 0x1e7   :  { %1742 = vmatmul.msk.f32.gmra.mxu0 %vm61_vm0, %v3444_v29 }
 0x1e8   :  { %1707 = vmatmul.msk.f32.gmra.mxu3 %vm61_vm0, %v3430_v31 }
 0x1e9   :  { %v358_v35 = vpop.f32.mrf.mxu2 }
 0x1ea   :  { %v2335_v36 = vadd.f32 %v2195_v32, %v358_v35 }
 0x1eb   :  { %v280_v38 = vpop.f32.mrf.mxu1 }
 0x1ec   :  { %3514 = vst [vmem:[#allocation10_spill] sm:$0xff] %v2335_v36  ;;  %v3441_v40 = vmax.f32 %v2335_v36, 0.0  ;;  %v2339_v42 = vadd.f32 %v2195_v32, %v280_v38 }
 0x1ee   :  { %3515 = vst [vmem:[#allocation11_spill] sm:$0xff] %v2339_v42  ;;  %v3429_v43 = vmax.f32 %v2339_v42, 0.0 }
 0x1ef   :  { %1743 = vmatmul.msk.f32.gmra.mxu0 %vm61_vm0, %v3441_v40 }
 0x1f0   :  { %1708 = vmatmul.msk.f32.gmra.mxu3 %vm61_vm0, %v3429_v43 }
 0x1f1   :  { %v361_v49 = vpop.f32.mrf.mxu2 }
 0x1f2   :  { %v2349_v51 = vadd.f32 %v2195_v32, %v361_v49 }
 0x1f3   :  { %v283_v52 = vpop.f32.mrf.mxu1 }
 0x1f4   :  { %3516 = vst [vmem:[#allocation12_spill] sm:$0xff] %v2349_v51  ;;  %v3439_v58 = vmax.f32 %v2349_v51, 0.0  ;;  %v2353_v59 = vadd.f32 %v2195_v32, %v283_v52 }
 0x1f6   :  { %3517 = vst [vmem:[#allocation13_spill] sm:$0xff] %v2353_v59  ;;  %v3428_v61 = vmax.f32 %v2353_v59, 0.0 }
 0x1f7   :  { %1744 = vmatmul.msk.f32.gmra.mxu0 %vm61_vm0, %v3439_v58 }
 0x1f8   :  { %1709 = vmatmul.msk.f32.gmra.mxu3 %vm61_vm0, %v3428_v61 }
 0x1f9   :  { %v364_v62 = vpop.f32.mrf.mxu2 }
 0x1fa   :  { %v2363_v4 = vadd.f32 %v2195_v32, %v364_v62 }
 0x1fb   :  { %v286_v6 = vpop.f32.mrf.mxu1 }
 0x1fc   :  { %3518 = vst [vmem:[#allocation14_spill] sm:$0xff] %v2363_v4  ;;  %v3436_v7 = vmax.f32 %v2363_v4, 0.0  ;;  %v2367_v14 = vadd.f32 %v2195_v32, %v286_v6 }
 0x1fe   :  { %3519 = vst [vmem:[#allocation15_spill] sm:$0xff] %v2367_v14  ;;  %v3426_v17 = vmax.f32 %v2367_v14, 0.0 }
 0x1ff   :  { %1745 = vmatmul.msk.f32.gmra.mxu0 %vm61_vm0, %v3436_v7 }
 0x200   :  { %1710 = vmatmul.msk.f32.gmra.mxu3 %vm61_vm0, %v3426_v17 }
 0x201   :  { %v367_v18 = vpop.f32.mrf.mxu2 }
 0x202   :  { %v2377_v24 = vadd.f32 %v2195_v32, %v367_v18 }
 0x203   :  { %v289_v25 = vpop.f32.mrf.mxu1 }
 0x204   :  { %3520 = vst [vmem:[#allocation16_spill] sm:$0xff] %v2377_v24  ;;  %v3433_v27 = vmax.f32 %v2377_v24, 0.0  ;;  %v2381_v35 = vadd.f32 %v2195_v32, %v289_v25 }
 0x206   :  { %3521 = vst [vmem:[#allocation17_spill] sm:$0xff] %v2381_v35  ;;  %v3427_v38 = vmax.f32 %v2381_v35, 0.0 }
 0x207   :  { %1746 = vmatmul.msk.f32.gmra.mxu0 %vm61_vm0, %v3433_v27 }
 0x208   :  { %1711 = vmatmul.msk.f32.gmra.mxu3 %vm61_vm0, %v3427_v38 }
 0x209   :  { %v370_v49 = vpop.f32.mrf.mxu2 }
 0x20a   :  { %v2391_v52 = vadd.f32 %v2195_v32, %v370_v49 }
 0x20b   :  { %v292_v62 = vpop.f32.mrf.mxu1 }
 0x20c   :  { %3522 = vst [vmem:[#allocation18_spill] sm:$0xff] %v2391_v52  ;;  %v3431_v6 = vmax.f32 %v2391_v52, 0.0  ;;  %v2395_v18 = vadd.f32 %v2195_v32, %v292_v62 }
 0x20e   :  { %v3464_v25 = vmax.f32 %v2395_v18, 0.0 }
 0x20f   :  { %1747 = vmatmul.msk.f32.gmra.mxu0 %vm61_vm0, %v3431_v6 }
 0x210   :  { %1716 = vmatmul.msk.f32.vlgmr.msra.gmra.mxu3 %vm61_vm0, %v3464_v25 }
 0x211   :  { %v373_v17 = vpop.f32.mrf.mxu2 }
 0x212   :  { %v2405_v49 = vadd.f32 %v2195_v32, %v373_v17 }
 0x213   :  { %v295_v38 = vpop.f32.mrf.mxu1 }
 0x214   :  { %3523 = vst [vmem:[#allocation19_spill] sm:$0xff] %v2405_v49  ;;  %v3434_v61 = vmax.f32 %v2405_v49, 0.0  ;;  %v2409_v62 = vadd.f32 %v2195_v32, %v295_v38 }
 0x216   :  { %v3460_v43 = vmax.f32 %v2409_v62, 0.0 }
 0x217   :  { %1748 = vmatmul.msk.f32.gmra.mxu0 %vm61_vm0, %v3434_v61 }
 0x218   :  { %1717 = vmatmul.msk.f32.gmra.mxu3 %vm61_vm0, %v3460_v43 }
 0x219   :  { %v376_v31 = vpop.f32.mrf.mxu2 }
 0x21a   :  { %v2419_v17 = vadd.f32 %v2195_v32, %v376_v31 }
 0x21b   :  { %v298_v6 = vpop.f32.mrf.mxu1 }
 0x21c   :  { %3524 = vst [vmem:[#allocation20_spill] sm:$0xff] %v2419_v17  ;;  %v3438_v23 = vmax.f32 %v2419_v17, 0.0  ;;  %v2423_v38 = vadd.f32 %v2195_v32, %v298_v6 }
 0x21e   :  { %v3457_v27 = vmax.f32 %v2423_v38, 0.0 }
 0x21f   :  { %1749 = vmatmul.msk.f32.gmra.mxu0 %vm61_vm0, %v3438_v23 }
 0x220   :  { %1718 = vmatmul.msk.f32.gmra.mxu3 %vm61_vm0, %v3457_v27 }
 0x221   :  { %v379_v61 = vpop.f32.mrf.mxu2 }
 0x222   :  { %v2433_v31 = vadd.f32 %v2195_v32, %v379_v61 }
 0x223   :  { %v301_v12 = vpop.f32.mrf.mxu1 }
 0x224   :  { %3525 = vst [vmem:[#allocation21_spill] sm:$0xff] %v2433_v31  ;;  %v3442_v7 = vmax.f32 %v2433_v31, 0.0  ;;  %v2437_v6 = vadd.f32 %v2195_v32, %v301_v12 }
 0x226   :  { %v3453_v2 = vmax.f32 %v2437_v6, 0.0 }
 0x227   :  { %1750 = vmatmul.msk.f32.gmra.mxu0 %vm61_vm0, %v3442_v7 }
 0x228   :  { %1719 = vmatmul.msk.f32.gmra.mxu3 %vm61_vm0, %v3453_v2 }
 0x229   :  { %v382_v23 = vpop.f32.mrf.mxu2 }
 0x22a   :  { %v2447_v61 = vadd.f32 %v2195_v32, %v382_v23 }
 0x22b   :  { %v304_v58 = vpop.f32.mrf.mxu1 }
 0x22c   :  { %3526 = vst [vmem:[#allocation22_spill] sm:$0xff] %v2447_v61  ;;  %v3446_v56 = vmax.f32 %v2447_v61, 0.0  ;;  %v2451_v12 = vadd.f32 %v2195_v32, %v304_v58 }
 0x22e   :  { %v3448_v40 = vmax.f32 %v2451_v12, 0.0 }
 0x22f   :  { %1751 = vmatmul.msk.f32.gmra.mxu0 %vm61_vm0, %v3446_v56 }
 0x230   :  { %1720 = vmatmul.msk.f32.gmra.mxu3 %vm61_vm0, %v3448_v40 }
 0x231   :  { %v385_v7 = vpop.f32.mrf.mxu2 }
 0x232   :  { %v2461_v23 = vadd.f32 %v2195_v32, %v385_v7 }
 0x233   :  { %v307_v47 = vpop.f32.mrf.mxu1 }
 0x234   :  { %3527 = vst [vmem:[#allocation23_spill] sm:$0xff] %v2461_v23  ;;  %v3450_v29 = vmax.f32 %v2461_v23, 0.0  ;;  %v2465_v58 = vadd.f32 %v2195_v32, %v307_v47  ;;  %v2480_v47 = vld [vmem:[%s3423_s5] ss:$0 sm:$0xff] }
 0x236   :  { %v3451_v19 = vmax.f32 %v2465_v58, 0.0 }
 0x237   :  { %1752 = vmatmul.msk.f32.gmra.mxu0 %vm61_vm0, %v3450_v29 }
 0x238   :  { %1721 = vmatmul.msk.f32.gmra.mxu3 %vm61_vm0, %v3451_v19 }
 0x239   :  { %v505_v56 = vpop.f32.mrf.mxu2 }
 0x23a   :  { %1785 = vtanh.f32 %v505_v56  ;;  %v2489_v56 = vld [vmem:[%s3423_s5 + $0x2] ss:$0 sm:$0xff] }
 0x23b   :  { %v310_v7 = vpop.f32.mrf.mxu1 }
 0x23c   :  { %v2475_v20 = vadd.f32 %v2195_v32, %v310_v7  ;;  %v911_v40 = vpop.f32.mrf.mxu0 }
 0x23d   :  { %1787 = vtanh.f32 %v911_v40 }
 0x23e   :  { %v3456_v8 = vmax.f32 %v2475_v20, 0.0 }
 0x240   :  { %v1786_v29 = vpop.eup %1785  ;;  %1722 = vmatmul.msk.f32.gmra.mxu3 %vm61_vm0, %v3456_v8 }
 0x241   :  { %v508_v7 = vpop.f32.mrf.mxu2  ;;  %v573_v40 = vmul.f32 %v1786_v29, %v2480_v47 }
 0x242   :  { %1789 = vtanh.f32 %v508_v7 }
 0x243   :  { %v1788_v19 = vpop.eup %1787  ;;  %v313_v9 = vpop.f32.mrf.mxu1  ;;  %v590_v63 = vsel %vm589_vm1, %v573_v40, 0.0 }
 0x244   :  { %v523_v2 = vpop.f32.mrf.mxu3  ;;  %v2494_v0 = vadd.f32 %v2195_v32, %v313_v9  ;;  %591 = vadd.xlane.f32.xlu0 %v590_v63  ;;  %v914_v8 = vpop.f32.mrf.mxu0  ;;  %v980_v27 = vmul.f32 %v1788_v19, %v2489_v56 }
 0x245   :  { %1791 = vtanh.f32 %v523_v2 }
 0x246   :  { %3528 = vst [vmem:[#allocation24_spill] sm:$0xff] %v2494_v0  ;;  %v3462_v53 = vmax.f32 %v2494_v0, 0.0  ;;  %v996_v54 = vsel %vm589_vm1, %v980_v27, 0.0 }
 0x247   :  { %997 = vadd.xlane.f32.xlu2 %v996_v54 }
 0x248   :  { %v1790_v29 = vpop.eup %1789  ;;  %1723 = vmatmul.msk.f32.gmra.mxu3 %vm61_vm0, %v3462_v53 }
 0x249   :  { %v511_v7 = vpop.f32.mrf.mxu2  ;;  %v574_v40 = vmul.f32 %v1790_v29, %v2480_v47 }
 0x24a   :  { %1793 = vtanh.f32 %v511_v7 }
 0x24b   :  { %v316_v9 = vpop.f32.mrf.mxu1  ;;  %v593_v43 = vsel %vm589_vm1, %v574_v40, 0.0  ;;  %v1792_v19 = vpop.eup %1791  ;;  %1795 = vtanh.f32 %v914_v8 }
 0x24c   :  { %v526_v63 = vpop.f32.mrf.mxu3  ;;  %v2505_v44 = vadd.f32 %v2195_v32, %v316_v9  ;;  %594 = vadd.xlane.f32.xlu0 %v593_v43  ;;  %v917_v54 = vpop.f32.mrf.mxu0  ;;  %v579_v27 = vmul.f32 %v1792_v19, %v2480_v47 }
 0x24d   :  { %1797 = vtanh.f32 %v526_v63 }
 0x24e   :  { %3529 = vst [vmem:[#allocation25_spill] sm:$0xff] %v2505_v44  ;;  %v3465_v2 = vmax.f32 %v2505_v44, 0.0  ;;  %1799 = vtanh.f32 %v917_v54  ;;  %v608_v8 = vsel %vm589_vm1, %v579_v27, 0.0 }
 0x250   :  { %v1794_v53 = vpop.eup %1793  ;;  %1724 = vmatmul.msk.f32.gmra.mxu3 %vm61_vm0, %v3465_v2 }
 0x251   :  { %v514_v29 = vpop.f32.mrf.mxu2  ;;  %v575_v7 = vmul.f32 %v1794_v53, %v2480_v47  ;;  %v1796_v40 = vpop.eup %1795 }
 0x252   :  { %v981_v2 = vmul.f32 %v1796_v40, %v2489_v56 }
 0x253   :  { %v319_v45 = vpop.f32.mrf.mxu1  ;;  %v596_v43 = vsel %vm589_vm1, %v575_v7, 0.0  ;;  %v1798_v25 = vpop.eup %1797 }
 0x254   :  { %v529_v9 = vpop.f32.mrf.mxu3  ;;  %v2516_v63 = vadd.f32 %v2195_v32, %v319_v45  ;;  %609 = vadd.xlane.f32.xlu0 %v608_v8  ;;  %597 = vadd.xlane.f32.xlu1 %v596_v43  ;;  %v920_v19 = vpop.f32.mrf.mxu0  ;;  %v580_v37 = vmul.f32 %v1798_v25, %v2480_v47  ;;  %v999_v27 = vsel %vm589_vm1, %v981_v2, 0.0 }
 0x255   :  { %1801 = vtanh.f32 %v529_v9  ;;  %v1800_v54 = vpop.eup %1799 }
 0x256   :  { %3530 = vst [vmem:[#allocation26_spill] sm:$0xff] %v2516_v63  ;;  %v3468_v53 = vmax.f32 %v2516_v63, 0.0  ;;  %1803 = vtanh.f32 %v920_v19  ;;  %v611_v43 = vsel %vm589_vm1, %v580_v37, 0.0  ;;  %v982_v2 = vmul.f32 %v1800_v54, %v2489_v56 }
 0x258   :  { %1725 = vmatmul.msk.f32.gmra.mxu3 %vm61_vm0, %v3468_v53 }
 0x259   :  { %v517_v7 = vpop.f32.mrf.mxu2 }
 0x25b   :  { %v1802_v45 = vpop.eup %1801  ;;  %v322_v9 = vpop.f32.mrf.mxu1 }
 0x25c   :  { %v532_v8 = vpop.f32.mrf.mxu3  ;;  %v581_v40 = vmul.f32 %v1802_v45, %v2480_v47  ;;  %v1804_v61 = vpop.eup %1803  ;;  %v2528_v19 = vadd.f32 %v2195_v32, %v322_v9  ;;  %612 = vadd.xlane.f32.xlu1 %v611_v43  ;;  %1000 = vadd.xlane.f32.xlu0 %v999_v27  ;;  %v1002_v45 = vsel %vm589_vm1, %v982_v2, 0.0 }
 0x25d   :  { %1805 = vtanh.f32 %v532_v8  ;;  %v923_v25 = vpop.f32.mrf.mxu0  ;;  %v983_v37 = vmul.f32 %v1804_v61, %v2489_v56 }
 0x25e   :  { %3531 = vst [vmem:[#allocation27_spill] sm:$0xff] %v2528_v19  ;;  %1807 = vtanh.f32 %v514_v29  ;;  %v614_v53 = vsel %vm589_vm1, %v581_v40, 0.0  ;;  %v3470_v14 = vmax.f32 %v2528_v19, 0.0  ;;  %v2540_v29 = vadd.f32 %v2195_v32, %v2166_v10 }
 0x25f   :  { %615 = vadd.xlane.f32.xlu2 %v614_v53  ;;  %1809 = vtanh.f32 %v923_v25  ;;  %v1005_v8 = vsel %vm589_vm1, %v983_v37, 0.0 }
 0x260   :  { %1811 = vtanh.f32 %v517_v7  ;;  %1726 = vmatmul.msk.f32.gmra.mxu3 %vm61_vm0, %v3470_v14  ;;  %3532 = vst [vmem:[#allocation28_spill] sm:$0xff] %v2540_v29  ;;  %v3475_v2 = vmax.f32 %v2540_v29, 0.0 }
 0x261   :  { %v520_v7 = vpop.f32.mrf.mxu2 }
 0x263   :  { %v1806_v27 = vpop.eup %1805 }
 0x264   :  { %v1808_v9 = vpop.eup %1807  ;;  %v535_v54 = vpop.f32.mrf.mxu3  ;;  %v582_v53 = vmul.f32 %v1806_v27, %v2480_v47  ;;  %1003 = vadd.xlane.f32.xlu1 %v1002_v45  ;;  %v2554_v45 = vadd.f32 %v2195_v32, %v2174_v16 }
 0x265   :  { %v1810_v43 = vpop.eup %1809  ;;  %v926_v61 = vpop.f32.mrf.mxu0  ;;  %1813 = vtanh.f32 %v535_v54  ;;  %v576_v10 = vmul.f32 %v1808_v9, %v2480_v47 }
 0x266   :  { %v617_v40 = vsel %vm589_vm1, %v582_v53, 0.0  ;;  %v1812_v25 = vpop.eup %1811  ;;  %v984_v14 = vmul.f32 %v1810_v43, %v2489_v56  ;;  %1815 = vtanh.f32 %v520_v7  ;;  %3533 = vst [vmem:[#allocation29_spill] sm:$0xff] %v2554_v45 }
 0x267   :  { %1006 = vadd.xlane.f32.xlu2 %v1005_v8  ;;  %618 = vadd.xlane.f32.xlu0 %v617_v40  ;;  %v577_v37 = vmul.f32 %v1812_v25, %v2480_v47  ;;  %v599_v54 = vsel %vm589_vm1, %v576_v10, 0.0  ;;  %1817 = vtanh.f32 %v926_v61  ;;  %v3474_v40 = vmax.f32 %v2554_v45, 0.0 }
 0x268   :  { %1727 = vmatmul.msk.f32.gmra.mxu3 %vm61_vm0, %v3475_v2  ;;  %v1008_v8 = vsel %vm589_vm1, %v984_v14, 0.0  ;;  %v2567_v61 = vadd.f32 %v2195_v32, %v2182_v22 }
 0x269   :  { %v602_v43 = vsel %vm589_vm1, %v577_v37, 0.0 }
 0x26a   :  { %3534 = vst [vmem:[#allocation30_spill] sm:$0xff] %v2567_v61 }
 0x26b   :  { %v1814_v53 = vpop.eup %1813 }
 0x26c   :  { %v538_v27 = vpop.f32.mrf.mxu3  ;;  %600 = vadd.xlane.f32.xlu1 %v599_v54  ;;  %v1816_v7 = vpop.eup %1815  ;;  %v583_v25 = vmul.f32 %v1814_v53, %v2480_v47 }
 0x26d   :  { %v929_v9 = vpop.f32.mrf.mxu0  ;;  %1819 = vtanh.f32 %v538_v27  ;;  %v578_v16 = vmul.f32 %v1816_v7, %v2480_v47  ;;  %v1818_v14 = vpop.eup %1817 }
 0x26e   :  { %v620_v37 = vsel %vm589_vm1, %v583_v25, 0.0  ;;  %v985_v27 = vmul.f32 %v1818_v14, %v2489_v56 }
 0x26f   :  { %603 = vadd.xlane.f32.xlu2 %v602_v43  ;;  %1009 = vadd.xlane.f32.xlu0 %v1008_v8  ;;  %v605_v8 = vsel %vm589_vm1, %v578_v16, 0.0  ;;  %v3471_v43 = vmax.f32 %v2567_v61, 0.0  ;;  %v2580_v16 = vadd.f32 %v2195_v32, %v2190_v28 }
 0x270   :  { %1728 = vmatmul.msk.f32.gmra.mxu3 %vm61_vm0, %v3474_v40  ;;  %v1011_v22 = vsel %vm589_vm1, %v985_v27, 0.0 }
 0x271   :  { %3535 = vst [vmem:[#allocation31_spill] sm:$0xff] %v2580_v16  ;;  %v3472_v27 = vmax.f32 %v2580_v16, 0.0 }
 0x273   :  { %v1820_v53 = vpop.eup %1819 }
 0x274   :  { %v541_v10 = vpop.f32.mrf.mxu3  ;;  %621 = vadd.xlane.f32.xlu1 %v620_v37  ;;  %v584_v7 = vmul.f32 %v1820_v53, %v2480_v47 }
 0x275   :  { %1821 = vtanh.f32 %v541_v10  ;;  %v932_v54 = vpop.f32.mrf.mxu0 }
 0x276   :  { %1823 = vtanh.f32 %v929_v9 }
 0x277   :  { %606 = vadd.xlane.f32.xlu2 %v605_v8  ;;  %1825 = vtanh.f32 %v932_v54 }
 0x278   :  { %1729 = vmatmul.msk.f32.gmra.mxu3 %vm61_vm0, %v3471_v43  ;;  %v623_v43 = vsel %vm589_vm1, %v584_v7, 0.0 }
 0x27b   :  { %v1822_v25 = vpop.eup %1821 }
 0x27c   :  { %v544_v14 = vpop.f32.mrf.mxu3  ;;  %v585_v10 = vmul.f32 %v1822_v25, %v2480_v47  ;;  %v1824_v37 = vpop.eup %1823  ;;  %1012 = vadd.xlane.f32.xlu1 %v1011_v22  ;;  %v2593_v25 = vadd.f32 %v2195_v32, %v2200_v34 }
 0x27d   :  { %1827 = vtanh.f32 %v544_v14  ;;  %v935_v9 = vpop.f32.mrf.mxu0  ;;  %v1826_v54 = vpop.eup %1825  ;;  %v986_v28 = vmul.f32 %v1824_v37, %v2489_v56 }
 0x27e   :  { %v626_v8 = vsel %vm589_vm1, %v585_v10, 0.0  ;;  %1829 = vtanh.f32 %v935_v9  ;;  %v987_v53 = vmul.f32 %v1826_v54, %v2489_v56  ;;  %3536 = vst [vmem:[#allocation32_spill] sm:$0xff] %v2593_v25 }
 0x27f   :  { %627 = vadd.xlane.f32.xlu0 %v626_v8  ;;  %624 = vadd.xlane.f32.xlu2 %v623_v43  ;;  %v1014_v10 = vsel %vm589_vm1, %v986_v28, 0.0 }
 0x280   :  { %1730 = vmatmul.msk.f32.gmra.mxu3 %vm61_vm0, %v3472_v27  ;;  %v1017_v37 = vsel %vm589_vm1, %v987_v53, 0.0  ;;  %v3473_v27 = vmax.f32 %v2593_v25, 0.0 }
 0x283   :  { %v1828_v22 = vpop.eup %1827 }
 0x284   :  { %v547_v14 = vpop.f32.mrf.mxu3  ;;  %v586_v7 = vmul.f32 %v1828_v22, %v2480_v47  ;;  %v1830_v43 = vpop.eup %1829 }
 0x285   :  { %1831 = vtanh.f32 %v547_v14  ;;  %v938_v9 = vpop.f32.mrf.mxu0  ;;  %v988_v32 = vmul.f32 %v1830_v43, %v2489_v56 }
 0x286   :  { %v629_v8 = vsel %vm589_vm1, %v586_v7, 0.0  ;;  %1833 = vtanh.f32 %v938_v9 }
 0x287   :  { %630 = vadd.xlane.f32.xlu1 %v629_v8  ;;  %1015 = vadd.xlane.f32.xlu2 %v1014_v10  ;;  %v1020_v53 = vsel %vm589_vm1, %v988_v32, 0.0 }
 0x288   :  { %1018 = vadd.xlane.f32.xlu0 %v1017_v37  ;;  %1731 = vmatmul.msk.f32.gmra.mxu3 %vm61_vm0, %v3473_v27 }
 0x28b   :  { %v1832_v34 = vpop.eup %1831 }
 0x28c   :  { %v550_v54 = vpop.f32.mrf.mxu3  ;;  %v587_v28 = vmul.f32 %v1832_v34, %v2480_v47  ;;  %v1834_v22 = vpop.eup %1833 }
 0x28d   :  { %1835 = vtanh.f32 %v550_v54  ;;  %v941_v14 = vpop.f32.mrf.mxu0  ;;  %v989_v10 = vmul.f32 %v1834_v22, %v2489_v56  ;;  %v2614_v54 = vld [vmem:[%s3423_s5 + $0x1] ss:$0 sm:$0xff] }
 0x28e   :  { %v632_v7 = vsel %vm589_vm1, %v587_v28, 0.0  ;;  %1837 = vtanh.f32 %v941_v14 }
 0x28f   :  { %633 = vadd.xlane.f32.xlu2 %v632_v7  ;;  %1021 = vadd.xlane.f32.xlu1 %v1020_v53  ;;  %v1023_v8 = vsel %vm589_vm1, %v989_v10, 0.0 }
 0x293   :  { %v1836_v43 = vpop.eup %1835 }
 0x294   :  { %v708_v37 = vpop.f32.mrf.mxu3  ;;  %v588_v9 = vmul.f32 %v1836_v43, %v2480_v47  ;;  %v1838_v27 = vpop.eup %1837 }
 0x295   :  { %1839 = vtanh.f32 %v708_v37  ;;  %v944_v34 = vpop.f32.mrf.mxu0  ;;  %v990_v28 = vmul.f32 %v1838_v27, %v2489_v56 }
 0x296   :  { %v635_v32 = vsel %vm589_vm1, %v588_v9, 0.0  ;;  %1841 = vtanh.f32 %v944_v34 }
 0x297   :  { %636 = vadd.xlane.f32.xlu0 %v635_v32  ;;  %1024 = vadd.xlane.f32.xlu2 %v1023_v8  ;;  %v1026_v14 = vsel %vm589_vm1, %v990_v28, 0.0 }
 0x29b   :  { %v1840_v53 = vpop.eup %1839 }
 0x29c   :  { %v711_v22 = vpop.f32.mrf.mxu3  ;;  %v777_v47 = vmul.f32 %v1840_v53, %v2614_v54  ;;  %v1842_v7 = vpop.eup %1841 }
 0x29d   :  { %1843 = vtanh.f32 %v711_v22  ;;  %v947_v10 = vpop.f32.mrf.mxu0  ;;  %v991_v37 = vmul.f32 %v1842_v7, %v2489_v56 }
 0x29e   :  { %v793_v43 = vsel %vm589_vm1, %v777_v47, 0.0  ;;  %1845 = vtanh.f32 %v947_v10 }
 0x29f   :  { %794 = vadd.xlane.f32.xlu1 %v793_v43  ;;  %1027 = vadd.xlane.f32.xlu0 %v1026_v14  ;;  %v1029_v34 = vsel %vm589_vm1, %v991_v37, 0.0 }
 0x2a3   :  { %v1844_v9 = vpop.eup %1843 }
 0x2a4   :  { %v714_v8 = vpop.f32.mrf.mxu3  ;;  %v778_v27 = vmul.f32 %v1844_v9, %v2614_v54  ;;  %v1846_v32 = vpop.eup %1845 }
 0x2a5   :  { %1847 = vtanh.f32 %v714_v8  ;;  %v992_v53 = vmul.f32 %v1846_v32, %v2489_v56  ;;  %v950_v31 = vpop.f32.mrf.mxu0 }
 0x2a6   :  { %v796_v28 = vsel %vm589_vm1, %v778_v27, 0.0 }
 0x2a7   :  { %797 = vadd.xlane.f32.xlu2 %v796_v28  ;;  %1030 = vadd.xlane.f32.xlu1 %v1029_v34  ;;  %v1032_v7 = vsel %vm589_vm1, %v992_v53, 0.0 }
 0x2ab   :  { %v1848_v22 = vpop.eup %1847 }
 0x2ac   :  { %v717_v47 = vpop.f32.mrf.mxu3  ;;  %v779_v14 = vmul.f32 %v1848_v22, %v2614_v54 }
 0x2ad   :  { %1849 = vtanh.f32 %v717_v47 }
 0x2ae   :  { %v799_v10 = vsel %vm589_vm1, %v779_v14, 0.0 }
 0x2af   :  { %800 = vadd.xlane.f32.xlu0 %v799_v10  ;;  %1033 = vadd.xlane.f32.xlu2 %v1032_v7 }
 0x2b3   :  { %v1850_v43 = vpop.eup %1849 }
 0x2b4   :  { %v720_v37 = vpop.f32.mrf.mxu3  ;;  %v780_v9 = vmul.f32 %v1850_v43, %v2614_v54 }
 0x2b5   :  { %1851 = vtanh.f32 %v720_v37 }
 0x2b6   :  { %v802_v8 = vsel %vm589_vm1, %v780_v9, 0.0 }
 0x2b7   :  { %803 = vadd.xlane.f32.xlu1 %v802_v8  ;;  %v2633_v14 = vpop.xlane.xlu0 %591 }
 0x2ba   :  { %v2638_v43 = vpop.xlane.xlu2 %997 }
 0x2bb   :  { %v1852_v27 = vpop.eup %1851 }
 0x2bc   :  { %v723_v34 = vpop.f32.mrf.mxu3  ;;  %v781_v32 = vmul.f32 %v1852_v27, %v2614_v54 }
 0x2bd   :  { %1853 = vtanh.f32 %v723_v34 }
 0x2be   :  { %v805_v28 = vsel %vm589_vm1, %v781_v32, 0.0 }
 0x2bf   :  { %806 = vadd.xlane.f32.xlu2 %v805_v28  ;;  %v2642_v34 = vpop.xlane.xlu0 %594 }
 0x2c3   :  { %v1854_v53 = vpop.eup %1853 }
 0x2c4   :  { %v726_v22 = vpop.f32.mrf.mxu3  ;;  %v782_v47 = vmul.f32 %v1854_v53, %v2614_v54 }
 0x2c5   :  { %1855 = vtanh.f32 %v726_v22 }
 0x2c6   :  { %v808_v7 = vsel %vm589_vm1, %v782_v47, 0.0 }
 0x2c7   :  { %809 = vadd.xlane.f32.xlu0 %v808_v7  ;;  %v2636_v10 = vpop.xlane.xlu1 %597  ;;  %v2650_v40 = vpop.xlane.xlu0 %609 }
 0x2cb   :  { %v1856_v37 = vpop.eup %1855 }
 0x2cc   :  { %v729_v9 = vpop.f32.mrf.mxu3  ;;  %v783_v8 = vmul.f32 %v1856_v37, %v2614_v54 }
 0x2cd   :  { %1857 = vtanh.f32 %v729_v9 }
 0x2ce   :  { %v811_v27 = vsel %vm589_vm1, %v783_v8, 0.0 }
 0x2cf   :  { %812 = vadd.xlane.f32.xlu1 %v811_v27  ;;  %v2644_v32 = vpop.xlane.xlu1 %612  ;;  %v2658_v23 = vpop.xlane.xlu0 %1000 }
 0x2d2   :  { %v2646_v28 = vpop.xlane.xlu2 %615 }
 0x2d3   :  { %v1858_v53 = vpop.eup %1857 }
 0x2d4   :  { %v732_v22 = vpop.f32.mrf.mxu3  ;;  %v784_v47 = vmul.f32 %v1858_v53, %v2614_v54 }
 0x2d5   :  { %1859 = vtanh.f32 %v732_v22 }
 0x2d6   :  { %v814_v7 = vsel %vm589_vm1, %v784_v47, 0.0 }
 0x2d7   :  { %815 = vadd.xlane.f32.xlu2 %v814_v7  ;;  %v2652_v37 = vpop.xlane.xlu1 %1003 }
 0x2da   :  { %v2654_v9 = vpop.xlane.xlu2 %1006 }
 0x2db   :  { %v1860_v8 = vpop.eup %1859 }
 0x2dc   :  { %v735_v27 = vpop.f32.mrf.mxu3  ;;  %v785_v2 = vmul.f32 %v1860_v8, %v2614_v54 }
 0x2dd   :  { %1861 = vtanh.f32 %v735_v27 }
 0x2de   :  { %v817_v16 = vsel %vm589_vm1, %v785_v2, 0.0  ;;  %v2668_v2 = vpop.xlane.xlu0 %618 }
 0x2df   :  { %818 = vadd.xlane.f32.xlu0 %v817_v16  ;;  %v2662_v47 = vpop.xlane.xlu1 %600 }
 0x2e2   :  { %v2660_v53 = vpop.xlane.xlu2 %603 }
 0x2e3   :  { %v1862_v22 = vpop.eup %1861 }
 0x2e4   :  { %v738_v7 = vpop.f32.mrf.mxu3  ;;  %v786_v25 = vmul.f32 %v1862_v22, %v2614_v54  ;;  %v953_v22 = vpop.f32.mrf.mxu0 }
 0x2e5   :  { %1863 = vtanh.f32 %v738_v7 }
 0x2e6   :  { %v820_v35 = vsel %vm589_vm1, %v786_v25, 0.0  ;;  %v2674_v45 = vpop.xlane.xlu0 %1009 }
 0x2e7   :  { %821 = vadd.xlane.f32.xlu1 %v820_v35  ;;  %v2671_v59 = vpop.xlane.xlu1 %621 }
 0x2ea   :  { %v2666_v8 = vpop.xlane.xlu2 %606 }
 0x2eb   :  { %v1864_v27 = vpop.eup %1863 }
 0x2ec   :  { %v741_v16 = vpop.f32.mrf.mxu3  ;;  %v787_v61 = vmul.f32 %v1864_v27, %v2614_v54 }
 0x2ed   :  { %1865 = vtanh.f32 %v741_v16 }
 0x2ee   :  { %v823_v17 = vsel %vm589_vm1, %v787_v61, 0.0 }
 0x2ef   :  { %824 = vadd.xlane.f32.xlu2 %v823_v17  ;;  %v2679_v49 = vpop.xlane.xlu1 %1012  ;;  %v956_v17 = vpop.f32.mrf.mxu0 }
 0x2f2   :  { %v2676_v35 = vpop.xlane.xlu2 %624  ;;  %v2683_v30 = vpop.xlane.xlu0 %627 }
 0x2f3   :  { %v1866_v7 = vpop.eup %1865  ;;  %3537 = vst [vmem:[#allocation33_spill] sm:$0xff] %v2676_v35 }
 0x2f4   :  { %v744_v25 = vpop.f32.mrf.mxu3  ;;  %v788_v42 = vmul.f32 %v1866_v7, %v2614_v54  ;;  %3538 = vst [vmem:[#allocation34_spill] sm:$0xff] %v2683_v30 }
 0x2f5   :  { %1867 = vtanh.f32 %v744_v25 }
 0x2f6   :  { %v826_v27 = vsel %vm589_vm1, %v788_v42, 0.0 }
 0x2f7   :  { %827 = vadd.xlane.f32.xlu0 %v826_v27 }
 0x2fa   :  { %v2685_v52 = vpop.xlane.xlu2 %1015  ;;  %v2688_v7 = vpop.xlane.xlu1 %630 }
 0x2fb   :  { %v1868_v16 = vpop.eup %1867  ;;  %3539 = vst [vmem:[#allocation35_spill] sm:$0xff] %v2688_v7  ;;  %v2691_v24 = vpop.xlane.xlu0 %1018 }
 0x2fc   :  { %v747_v29 = vpop.f32.mrf.mxu3  ;;  %v789_v61 = vmul.f32 %v1868_v16, %v2614_v54 }
 0x2fd   :  { %1869 = vtanh.f32 %v747_v29 }
 0x2fe   :  { %v829_v19 = vsel %vm589_vm1, %v789_v61, 0.0  ;;  %1871 = vtanh.f32 %v956_v17 }
 0x2ff   :  { %830 = vadd.xlane.f32.xlu1 %v829_v19 }
 0x302   :  { %v2694_v16 = vpop.xlane.xlu2 %633  ;;  %v2696_v63 = vpop.xlane.xlu1 %1021 }
 0x303   :  { %v1870_v25 = vpop.eup %1869  ;;  %3540 = vst [vmem:[#allocation36_spill] sm:$0xff] %v2694_v16 }
 0x304   :  { %v750_v21 = vpop.f32.mrf.mxu3  ;;  %v790_v42 = vmul.f32 %v1870_v25, %v2614_v54  ;;  %v1872_v27 = vpop.eup %1871 }
 0x305   :  { %1873 = vtanh.f32 %v750_v21  ;;  %v995_v19 = vmul.f32 %v1872_v27, %v2489_v56 }
 0x306   :  { %v832_v29 = vsel %vm589_vm1, %v790_v42, 0.0  ;;  %1875 = vtanh.f32 %v950_v31 }
 0x307   :  { %833 = vadd.xlane.f32.xlu2 %v832_v29  ;;  %v1041_v25 = vsel %vm589_vm1, %v995_v19, 0.0 }
 0x30a   :  { %v2702_v42 = vpop.xlane.xlu0 %636  ;;  %v2704_v29 = vpop.xlane.xlu2 %1024 }
 0x30b   :  { %v1874_v61 = vpop.eup %1873  ;;  %3541 = vst [vmem:[#allocation37_spill] sm:$0xff] %v2702_v42 }
 0x30c   :  { %v753_v17 = vpop.f32.mrf.mxu3  ;;  %v791_v11 = vmul.f32 %v1874_v61, %v2614_v54  ;;  %v1876_v7 = vpop.eup %1875 }
 0x30d   :  { %1877 = vtanh.f32 %v753_v17  ;;  %v993_v31 = vmul.f32 %v1876_v7, %v2489_v56 }
 0x30e   :  { %v835_v21 = vsel %vm589_vm1, %v791_v11, 0.0  ;;  %1879 = vtanh.f32 %v953_v22 }
 0x30f   :  { %836 = vadd.xlane.f32.xlu0 %v835_v21  ;;  %1042 = vadd.xlane.f32.xlu2 %v1041_v25  ;;  %v1035_v11 = vsel %vm589_vm1, %v993_v31, 0.0 }
 0x312   :  { %v795_v16 = vpop.xlane.xlu1 %794  ;;  %v2714_v7 = vpop.xlane.xlu0 %1027 }
 0x313   :  { %v1878_v27 = vpop.eup %1877  ;;  %v1044_v4 = vmax.f32 %v2633_v14, %v795_v16 }
 0x314   :  { %v792_v61 = vmul.f32 %v1878_v27, %v2614_v54  ;;  %v1880_v25 = vpop.eup %1879 }
 0x315   :  { %v1060_v19 = vmax.f32 %v1044_v4, %v2638_v43  ;;  %v994_v4 = vmul.f32 %v1880_v25, %v2489_v56 }
 0x316   :  { %v838_v17 = vsel %vm589_vm1, %v792_v61, 0.0 }
 0x317   :  { %v1076_v21 = vsub.f32 %v2633_v14, %v1060_v19  ;;  %v1124_v42 = vsub.f32 %v795_v16, %v1060_v19  ;;  %v1172_v22 = vsub.f32 %v2638_v43, %v1060_v19  ;;  %1036 = vadd.xlane.f32.xlu0 %v1035_v11  ;;  %839 = vadd.xlane.f32.xlu1 %v838_v17  ;;  %v1038_v14 = vsel %vm589_vm1, %v994_v4, 0.0 }
 0x319   :  { %v1092_v44 = vmul.f32 1.442695, %v1076_v21  ;;  %v1140_v1 = vmul.f32 1.442695, %v1124_v42  ;;  %v1188_v51 = vmul.f32 1.442695, %v1172_v22 }
 0x31a   :  { %v798_v54 = vpop.xlane.xlu2 %797  ;;  %v2722_v42 = vpop.xlane.xlu1 %1030 }
 0x31b   :  { %1881 = vpow2.f32 %v1092_v44  ;;  %v1045_v31 = vmax.f32 %v2642_v34, %v798_v54  ;;  %3542 = vst [vmem:[#allocation38_spill] sm:$0xff] %v2722_v42 }
 0x31c   :  { %1883 = vpow2.f32 %v1140_v1 }
 0x31d   :  { %v1061_v27 = vmax.f32 %v1045_v31, %v2658_v23  ;;  %1885 = vpow2.f32 %v1188_v51 }
 0x31f   :  { %v1077_v43 = vsub.f32 %v2642_v34, %v1061_v27  ;;  %v1125_v16 = vsub.f32 %v798_v54, %v1061_v27  ;;  %v1173_v61 = vsub.f32 %v2658_v23, %v1061_v27  ;;  %1039 = vadd.xlane.f32.xlu1 %v1038_v14 }
 0x321   :  { %v2724_v19 = vpop.eup %1881  ;;  %v1094_v56 = vmul.f32 1.442695, %v1077_v43  ;;  %v1142_v44 = vmul.f32 1.442695, %v1125_v16  ;;  %v1190_v1 = vmul.f32 1.442695, %v1173_v61 }
 0x322   :  { %v2726_v11 = vpop.eup %1883  ;;  %v801_v17 = vpop.xlane.xlu0 %800 }
 0x323   :  { %v1220_v51 = vadd.f32 %v2726_v11, %v2724_v19  ;;  %1887 = vpow2.f32 %v1094_v56  ;;  %v1046_v34 = vmax.f32 %v2636_v10, %v801_v17  ;;  %v2731_v25 = vpop.eup %1885  ;;  %v2737_v31 = vpop.xlane.xlu2 %1033 }
 0x324   :  { %1889 = vpow2.f32 %v1142_v44  ;;  %3543 = vst [vmem:[#allocation39_spill] sm:$0xff] %v2737_v31 }
 0x325   :  { %v1236_v23 = vadd.f32 %v2731_v25, %v1220_v51  ;;  %v1062_v21 = vmax.f32 %v1046_v34, %v2652_v37  ;;  %1891 = vpow2.f32 %v1190_v1 }
 0x327   :  { %1893 = vrcp.f32 %v1236_v23  ;;  %v1078_v22 = vsub.f32 %v2636_v10, %v1062_v21  ;;  %v1126_v54 = vsub.f32 %v801_v17, %v1062_v21  ;;  %v1174_v4 = vsub.f32 %v2652_v37, %v1062_v21 }
 0x328   :  { %v1261_v31 = vand.u32 2147483647, %v1236_v23  ;;  %v1263_v0 = vand.u32 2147483648, %v1236_v23  ;;  %vm1257_vm5 = vweird.f32 %v1236_v23 }
 0x329   :  { %v2739_v27 = vpop.eup %1887  ;;  %v1096_v43 = vmul.f32 1.442695, %v1078_v22  ;;  %v1144_v16 = vmul.f32 1.442695, %v1126_v54  ;;  %v1192_v61 = vmul.f32 1.442695, %v1174_v4 }
 0x32a   :  { %v2741_v14 = vpop.eup %1889  ;;  %v804_v56 = vpop.xlane.xlu1 %803  ;;  %vm1262_vm7 = vcmp.eq.f32.partialorder %v1261_v31, 8.507059e+37 }
 0x32b   :  { %v1221_v44 = vadd.f32 %v2741_v14, %v2739_v27  ;;  %v1047_v1 = vmax.f32 %v2662_v47, %v804_v56  ;;  %v2746_v51 = vpop.eup %1891  ;;  %1895 = vpow2.f32 %v1096_v43 }
 0x32c   :  { %1897 = vpow2.f32 %v1144_v16 }
 0x32d   :  { %v1894_v10 = vpop.eup %1893  ;;  %v2749_v37 = vadd.f32 %v2746_v51, %v1221_v44  ;;  %v1063_v17 = vmax.f32 %v1047_v1, %v2654_v9  ;;  %1899 = vpow2.f32 %v1192_v61 }
 0x32e   :  { %v1253_v34 = vmul.f32 %v1894_v10, %v1236_v23  ;;  %vm1258_vm2 = vweird.f32 %v1894_v10 }
 0x32f   :  { %1901 = vrcp.f32 %v2749_v37  ;;  %v1079_v22 = vsub.f32 %v2662_v47, %v1063_v17  ;;  %v1127_v54 = vsub.f32 %v804_v56, %v1063_v17  ;;  %v1175_v4 = vsub.f32 %v2654_v9, %v1063_v17  ;;  %vm1259_vm6 = vmor %vm1257_vm5, %vm1258_vm2 }
 0x330   :  { %v1254_v21 = vsub.f32 1.0, %v1253_v34  ;;  %v1276_v42 = vand.u32 2147483647, %v2749_v37  ;;  %vm1272_vm9 = vweird.f32 %v2749_v37 }
 0x331   :  { %v2755_v43 = vpop.eup %1895  ;;  %v1098_v44 = vmul.f32 1.442695, %v1079_v22  ;;  %v1146_v16 = vmul.f32 1.442695, %v1127_v54  ;;  %v1194_v61 = vmul.f32 1.442695, %v1175_v4 }
 0x332   :  { %v1255_v55 = vmul.f32 %v1894_v10, %v1254_v21  ;;  %v807_v30 = vpop.xlane.xlu2 %806  ;;  %v2757_v1 = vpop.eup %1897  ;;  %v1264_v21 = vor.u32 1.1754944e-38, %v1263_v0  ;;  %vm2785_vm10 = vcmp.eq.f32.partialorder %v1276_v42, 8.507059e+37 }
 0x333   :  { %v1048_v34 = vmax.f32 %v2660_v53, %v807_v30  ;;  %v2760_v47 = vpop.eup %1899  ;;  %v1222_v9 = vadd.f32 %v2757_v1, %v2755_v43  ;;  %1903 = vpow2.f32 %v1098_v44 }
 0x334   :  { %v1256_v56 = vadd.f32 %v1894_v10, %v1255_v55  ;;  %1905 = vpow2.f32 %v1146_v16 }
 0x335   :  { %v1902_v17 = vpop.eup %1901  ;;  %v1064_v22 = vmax.f32 %v1048_v34, %v2674_v45  ;;  %v2769_v55 = vadd.f32 %v2760_v47, %v1222_v9  ;;  %1907 = vpow2.f32 %v1194_v61  ;;  %v3544_v61 = vmax.f32 %v2198_v33, 0.0 }
 0x336   :  { %v1260_v54 = vsel %vm1259_vm6, %v1894_v10, %v1256_v56  ;;  %v1268_v4 = vmul.f32 %v1902_v17, %v2749_v37  ;;  %v1278_v10 = vand.u32 2147483648, %v2749_v37  ;;  %vm1273_vm11 = vweird.f32 %v1902_v17 }
 0x337   :  { %v1265_v23 = vsel %vm1262_vm7, %v1264_v21, %v1260_v54  ;;  %v1080_v44 = vsub.f32 %v2660_v53, %v1064_v22  ;;  %v1128_v35 = vsub.f32 %v807_v30, %v1064_v22  ;;  %1909 = vrcp.f32 %v2769_v55  ;;  %vm1274_vm12 = vmor %vm1272_vm9, %vm1273_vm11 }
 0x338   :  { %v1266_v36 = vmul.f32 %v2724_v19, %v1265_v23  ;;  %v1492_v0 = vmul.f32 %v2726_v11, %v1265_v23  ;;  %v1508_v31 = vmul.f32 %v2731_v25, %v1265_v23  ;;  %v1269_v16 = vsub.f32 1.0, %v1268_v4 }
 0x339   :  { %v2778_v34 = vpop.eup %1903  ;;  %v3545_v30 = vmax.f32 %v2395_v18, 0.0  ;;  %v3548_v21 = vmax.f32 %v2213_v41, 0.0  ;;  %v1100_v18 = vmul.f32 1.442695, %v1080_v44  ;;  %v1148_v42 = vmul.f32 1.442695, %v1128_v35 }
 0x33a   :  { %v1524_v53 = vmul.f32 %v1266_v36, %v3544_v61  ;;  %v1621_v11 = vsel %vm1620_vm3, %v1266_v36, %v1492_v0  ;;  %v2789_v56 = vpop.xlane.xlu0 %809  ;;  %v2791_v9 = vpop.eup %1905  ;;  %v1270_v33 = vmul.f32 %v1902_v17, %v1269_v16  ;;  %v1279_v41 = vor.u32 1.1754944e-38, %v1278_v10 }
 0x33b   :  { %v1540_v19 = vmul.f32 %v1492_v0, %v3545_v30  ;;  %v1572_v54 = vmul.f32 %v1508_v31, %v3548_v21  ;;  %v1638_v4 = vsel %vm1637_vm4, %v1621_v11, %v1508_v31  ;;  %v1223_v36 = vadd.f32 %v2791_v9, %v2778_v34  ;;  %v2802_v0 = vpop.eup %1907 }
 0x33c   :  { %1655 = vst.msk [vmem:[%s3425_s7] sm:$0xff] %vm1654_vm8, %v1638_v4  ;;  %v1271_v61 = vadd.f32 %v1902_v17, %v1270_v33  ;;  %v1176_v30 = vsub.f32 %v2674_v45, %v1064_v22  ;;  %v1049_v31 = vmax.f32 %v2666_v8, %v2789_v56  ;;  %1911 = vpow2.f32 %v1100_v18 }
 0x33d   :  { %v1556_v23 = vadd.f32 %v1540_v19, %v1524_v53  ;;  %v1291_v53 = vand.u32 2147483647, %v2769_v55  ;;  %v2811_v19 = vadd.f32 %v2802_v0, %v1223_v36  ;;  %v1910_v35 = vpop.eup %1909  ;;  %v1293_v11 = vand.u32 2147483648, %v2769_v55 }
 0x33e   :  { %v1275_v44 = vsel %vm1274_vm12, %v1902_v17, %v1271_v61  ;;  %1913 = vpow2.f32 %v1148_v42  ;;  %v1196_v10 = vmul.f32 1.442695, %v1176_v30  ;;  %v1283_v37 = vmul.f32 %v1910_v35, %v2769_v55 }
 0x33f   :  { %v1588_v16 = vadd.f32 %v1572_v54, %v1556_v23  ;;  %v1280_v45 = vsel %vm2785_vm10, %v1279_v41, %v1275_v44  ;;  %1915 = vrcp.f32 %v2811_v19  ;;  %v1065_v54 = vmax.f32 %v1049_v31, %v2679_v49 }
 0x340   :  { %v1281_v22 = vmul.f32 %v2739_v27, %v1280_v45  ;;  %v1493_v17 = vmul.f32 %v2741_v14, %v1280_v45  ;;  %v1509_v21 = vmul.f32 %v2746_v51, %v1280_v45  ;;  %v1284_v4 = vsub.f32 1.0, %v1283_v37 }
 0x341   :  { %1604 = vst.msk [vmem:[%s3424_s6] sm:$0xff] %vm61_vm0, %v1588_v16  ;;  %vm1287_vm13 = vweird.f32 %v2769_v55  ;;  %vm2827_vm14 = vcmp.eq.f32.partialorder %v1291_v53, 8.507059e+37  ;;  %1917 = vpow2.f32 %v1196_v10  ;;  %v3551_v25 = vmax.f32 %v2210_v39, 0.0 }
 0x342   :  { %v3552_v36 = vmax.f32 %v2409_v62, 0.0  ;;  %v1622_v14 = vsel %vm1620_vm3, %v1281_v22, %v1493_v17  ;;  %v1294_v18 = vor.u32 1.1754944e-38, %v1293_v11  ;;  %v2836_v51 = vpop.xlane.xlu1 %812  ;;  %v2838_v42 = vpop.eup %1911  ;;  %v3553_v61 = vmax.f32 %v2234_v50, 0.0 }
 0x343   :  { %v1525_v23 = vmul.f32 %v1281_v22, %v3551_v25  ;;  %v1639_v30 = vsel %vm1637_vm4, %v1622_v14, %v1509_v21  ;;  %v1285_v31 = vmul.f32 %v1910_v35, %v1284_v4  ;;  %vm1288_vm15 = vweird.f32 %v1910_v35 }
 0x344   :  { %v1541_v27 = vmul.f32 %v1493_v17, %v3552_v36  ;;  %v1573_v41 = vmul.f32 %v1509_v21, %v3553_v61  ;;  %v2843_v16 = vpop.eup %1913  ;;  %1656 = vst.msk [vmem:[%s3425_s7 + $0x8] sm:$0xff] %vm1654_vm8, %v1639_v30  ;;  %vm1302_vm1 = vweird.f32 %v2811_v19  ;;  %v1081_v62 = vsub.f32 %v2666_v8, %v1065_v54  ;;  %vm1289_vm2 = vmor %vm1287_vm13, %vm1288_vm15 }
 0x345   :  { %v1129_v53 = vsub.f32 %v2789_v56, %v1065_v54  ;;  %v1177_v50 = vsub.f32 %v2679_v49, %v1065_v54  ;;  %v1916_v44 = vpop.eup %1915  ;;  %v1286_v11 = vadd.f32 %v1910_v35, %v1285_v31  ;;  %v1306_v10 = vand.u32 2147483647, %v2811_v19 }
 0x346   :  { %v1557_v39 = vadd.f32 %v1541_v27, %v1525_v23  ;;  %v1224_v45 = vadd.f32 %v2843_v16, %v2838_v42  ;;  %v1050_v37 = vmax.f32 %v2650_v40, %v2836_v51  ;;  %v1298_v8 = vmul.f32 %v1916_v44, %v2811_v19 }
 0x347   :  { %v1308_v56 = vand.u32 2147483648, %v2811_v19  ;;  %v1102_v17 = vmul.f32 1.442695, %v1081_v62  ;;  %v2862_v49 = vpop.eup %1917  ;;  %v1290_v21 = vsel %vm1289_vm2, %v1910_v35, %v1286_v11  ;;  %v1150_v54 = vmul.f32 1.442695, %v1129_v53 }
 0x348   :  { %v1589_v22 = vadd.f32 %v1573_v41, %v1557_v39  ;;  %v1198_v4 = vmul.f32 1.442695, %v1177_v50  ;;  %v1066_v25 = vmax.f32 %v1050_v37, %v2685_v52  ;;  %v1295_v55 = vsel %vm2827_vm14, %v1294_v18, %v1290_v21 }
 0x349   :  { %v1299_v23 = vsub.f32 1.0, %v1298_v8  ;;  %v2872_v36 = vadd.f32 %v2862_v49, %v1224_v45  ;;  %1919 = vpow2.f32 %v1102_v17  ;;  %v1296_v27 = vmul.f32 %v2755_v43, %v1295_v55 }
 0x34a   :  { %1605 = vst.msk [vmem:[%s3424_s6 + $0x8] sm:$0xff] %vm61_vm0, %v1589_v22  ;;  %v1494_v35 = vmul.f32 %v2757_v1, %v1295_v55  ;;  %v1510_v14 = vmul.f32 %v2760_v47, %v1295_v55  ;;  %1921 = vpow2.f32 %v1150_v54  ;;  %vm1303_vm5 = vweird.f32 %v1916_v44  ;;  %v816_v39 = vpop.xlane.xlu2 %815 }
 0x34b   :  { %v1300_v61 = vmul.f32 %v1916_v44, %v1299_v23  ;;  %vm2877_vm6 = vcmp.eq.f32.partialorder %v1306_v10, 8.507059e+37  ;;  %1923 = vrcp.f32 %v2872_v36  ;;  %v3556_v33 = vmax.f32 %v2228_v48, 0.0  ;;  %vm1304_vm7 = vmor %vm1302_vm1, %vm1303_vm5 }
 0x34c   :  { %v3557_v30 = vmax.f32 %v2423_v38, 0.0  ;;  %v1623_v43 = vsel %vm1620_vm3, %v1296_v27, %v1494_v35  ;;  %v1309_v1 = vor.u32 1.1754944e-38, %v1308_v56  ;;  %v3558_v47 = vmax.f32 %v2258_v60, 0.0 }
 0x34d   :  { %v1526_v18 = vmul.f32 %v1296_v27, %v3556_v33  ;;  %v1640_v53 = vsel %vm1637_vm4, %v1623_v43, %v1510_v14  ;;  %v1301_v50 = vadd.f32 %v1916_v44, %v1300_v61  ;;  %v1321_v11 = vand.u32 2147483647, %v2872_v36 }
 0x34e   :  { %v1542_v31 = vmul.f32 %v1494_v35, %v3557_v30  ;;  %v1574_v62 = vmul.f32 %v1510_v14, %v3558_v47  ;;  %1657 = vst.msk [vmem:[%s3425_s7 + $0x10] sm:$0xff] %vm1654_vm8, %v1640_v53  ;;  %1925 = vpow2.f32 %v1198_v4  ;;  %v1082_v48 = vsub.f32 %v2650_v40, %v1066_v25 }
 0x34f   :  { %v1130_v60 = vsub.f32 %v2836_v51, %v1066_v25  ;;  %v2899_v38 = vpop.eup %1919  ;;  %v1305_v45 = vsel %vm1304_vm7, %v1916_v44, %v1301_v50  ;;  %v1323_v37 = vand.u32 2147483648, %v2872_v36  ;;  %v1178_v22 = vsub.f32 %v2685_v52, %v1066_v25 }
 0x350   :  { %v1558_v10 = vadd.f32 %v1542_v31, %v1526_v18  ;;  %v1051_v8 = vmax.f32 %v2644_v32, %v816_v39  ;;  %v2904_v56 = vpop.eup %1921  ;;  %v1310_v19 = vsel %vm2877_vm6, %v1309_v1, %v1305_v45  ;;  %v1104_v21 = vmul.f32 1.442695, %v1082_v48 }
 0x351   :  { %v1152_v54 = vmul.f32 1.442695, %v1130_v60  ;;  %v1924_v40 = vpop.eup %1923  ;;  %v1311_v51 = vmul.f32 %v2778_v34, %v1310_v19  ;;  %v1495_v4 = vmul.f32 %v2791_v9, %v1310_v19  ;;  %v1511_v44 = vmul.f32 %v2802_v0, %v1310_v19 }
 0x352   :  { %v1590_v17 = vadd.f32 %v1574_v62, %v1558_v10  ;;  %v1225_v52 = vadd.f32 %v2904_v56, %v2899_v38  ;;  %v1313_v25 = vmul.f32 %v1924_v40, %v2872_v36  ;;  %vm1318_vm9 = vweird.f32 %v1924_v40  ;;  %v2918_v23 = vpop.xlane.xlu0 %818 }
 0x353   :  { %1927 = vpow2.f32 %v1104_v21  ;;  %v1200_v55 = vmul.f32 1.442695, %v1178_v22  ;;  %v3559_v34 = vmax.f32 %v2249_v57, 0.0  ;;  %v3560_v0 = vmax.f32 %v2437_v6, 0.0 }
 0x354   :  { %1606 = vst.msk [vmem:[%s3424_s6 + $0x10] sm:$0xff] %vm61_vm0, %v1590_v17  ;;  %v3561_v35 = vmax.f32 %v2279_v5, 0.0  ;;  %v1624_v61 = vsel %vm1620_vm3, %v1311_v51, %v1495_v4  ;;  %v2927_v41 = vpop.eup %1925  ;;  %v1314_v18 = vsub.f32 1.0, %v1313_v25  ;;  %1929 = vpow2.f32 %v1152_v54 }
 0x355   :  { %v1527_v9 = vmul.f32 %v1311_v51, %v3559_v34  ;;  %v1543_v27 = vmul.f32 %v1495_v4, %v3560_v0  ;;  %v1641_v33 = vsel %vm1637_vm4, %v1624_v61, %v1511_v44  ;;  %v1067_v30 = vmax.f32 %v1051_v8, %v2691_v24 }
 0x356   :  { %v1575_v14 = vmul.f32 %v1511_v44, %v3561_v35  ;;  %1658 = vst.msk [vmem:[%s3425_s7 + $0x18] sm:$0xff] %vm1654_vm8, %v1641_v33  ;;  %v2936_v57 = vadd.f32 %v2927_v41, %v1225_v52  ;;  %1931 = vpow2.f32 %v1200_v55  ;;  %v1052_v5 = vmax.f32 %v2646_v28, %v2918_v23 }
 0x357   :  { %v1559_v31 = vadd.f32 %v1543_v27, %v1527_v9  ;;  %v1315_v6 = vmul.f32 %v1924_v40, %v1314_v18  ;;  %v1083_v43 = vsub.f32 %v2644_v32, %v1067_v30  ;;  %v1131_v1 = vsub.f32 %v816_v39, %v1067_v30 }
 0x358   :  { %v1179_v47 = vsub.f32 %v2691_v24, %v1067_v30  ;;  %1933 = vrcp.f32 %v2936_v57  ;;  %vm1317_vm10 = vweird.f32 %v2872_v36  ;;  %v1324_v32 = vor.u32 1.1754944e-38, %v1323_v37 }
 0x359   :  { %v1591_v62 = vadd.f32 %v1575_v14, %v1559_v31  ;;  %v2943_v53 = vpop.eup %1927  ;;  %v1316_v50 = vadd.f32 %v1924_v40, %v1315_v6  ;;  %v1106_v10 = vmul.f32 1.442695, %v1083_v43  ;;  %v1154_v48 = vmul.f32 1.442695, %v1131_v1  ;;  %vm1319_vm11 = vmor %vm1317_vm10, %vm1318_vm9 }
 0x35a   :  { %v1202_v39 = vmul.f32 1.442695, %v1179_v47  ;;  %v1068_v24 = vmax.f32 %v1052_v5, %v2696_v63  ;;  %v2952_v60 = vpop.eup %1929  ;;  %vm1322_vm12 = vcmp.eq.f32.partialorder %v1321_v11, 8.507059e+37  ;;  %v3562_v44 = vmax.f32 %v2273_v3, 0.0  ;;  %v2985_v9 = vpop.xlane.xlu1 %821 }
 0x35b   :  { %1607 = vst.msk [vmem:[%s3424_s6 + $0x18] sm:$0xff] %vm61_vm0, %v1591_v62  ;;  %v1320_v45 = vsel %vm1319_vm11, %v1924_v40, %v1316_v50  ;;  %1935 = vpow2.f32 %v1106_v10  ;;  %v1226_v8 = vadd.f32 %v2952_v60, %v2943_v53  ;;  %v1336_v55 = vand.u32 2147483647, %v2936_v57 }
 0x35c   :  { %v2954_v22 = vpop.eup %1931  ;;  %v1325_v36 = vsel %vm1322_vm12, %v1324_v32, %v1320_v45  ;;  %1937 = vpow2.f32 %v1154_v48  ;;  %v1084_v17 = vsub.f32 %v2646_v28, %v1068_v24  ;;  %v1132_v51 = vsub.f32 %v2918_v23, %v1068_v24 }
 0x35d   :  { %v1326_v19 = vmul.f32 %v2838_v42, %v1325_v36  ;;  %v1496_v37 = vmul.f32 %v2843_v16, %v1325_v36  ;;  %v1512_v21 = vmul.f32 %v2862_v49, %v1325_v36  ;;  %1939 = vpow2.f32 %v1202_v39 }
 0x35e   :  { %v1934_v54 = vpop.eup %1933  ;;  %v2963_v11 = vadd.f32 %v2954_v22, %v1226_v8  ;;  %v1108_v40 = vmul.f32 1.442695, %v1084_v17  ;;  %v1180_v4 = vsub.f32 %v2696_v63, %v1068_v24  ;;  %v3563_v28 = vmax.f32 %v2451_v12, 0.0 }
 0x35f   :  { %v1528_v52 = vmul.f32 %v1326_v19, %v3562_v44  ;;  %v1625_v16 = vsel %vm1620_vm3, %v1326_v19, %v1496_v37  ;;  %v1328_v25 = vmul.f32 %v1934_v54, %v2936_v57  ;;  %v3564_v63 = vmax.f32 %v2300_v15, 0.0 }
 0x360   :  { %v1544_v42 = vmul.f32 %v1496_v37, %v3563_v28  ;;  %v1642_v49 = vsel %vm1637_vm4, %v1625_v16, %v1512_v21  ;;  %1941 = vrcp.f32 %v2963_v11  ;;  %vm1333_vm13 = vweird.f32 %v1934_v54 }
 0x361   :  { %v2976_v34 = vpop.eup %1935  ;;  %v1576_v3 = vmul.f32 %v1512_v21, %v3564_v63  ;;  %1659 = vst.msk [vmem:[%s3425_s7 + $0x20] sm:$0xff] %vm1654_vm8, %v1642_v49  ;;  %v1338_v12 = vand.u32 2147483648, %v2936_v57  ;;  %v1329_v27 = vsub.f32 1.0, %v1328_v25  ;;  %1943 = vpow2.f32 %v1108_v40 }
 0x362   :  { %v1560_v23 = vadd.f32 %v1544_v42, %v1528_v52  ;;  %v2987_v0 = vpop.eup %1937  ;;  %v1156_v35 = vmul.f32 1.442695, %v1132_v51  ;;  %v1204_v14 = vmul.f32 1.442695, %v1180_v4  ;;  %v1351_v33 = vand.u32 2147483647, %v2963_v11  ;;  %v2995_v31 = vpop.xlane.xlu2 %824 }
 0x363   :  { %v2989_v61 = vpop.eup %1939  ;;  %v1353_v18 = vand.u32 2147483648, %v2963_v11  ;;  %v1227_v30 = vadd.f32 %v2987_v0, %v2976_v34  ;;  %v1330_v5 = vmul.f32 %v1934_v54, %v1329_v27  ;;  %v1053_v6 = vmax.f32 %v2668_v2, %v2985_v9 }
 0x364   :  { %v1592_v15 = vadd.f32 %v1576_v3, %v1560_v23  ;;  %1945 = vpow2.f32 %v1156_v35  ;;  %v1054_v43 = vmax.f32 %v2671_v59, %v2995_v31  ;;  %vm1332_vm14 = vweird.f32 %v2936_v57 }
 0x365   :  { %vm3006_vm15 = vcmp.eq.f32.partialorder %v1336_v55, 8.507059e+37  ;;  %v3011_v47 = vadd.f32 %v2989_v61, %v1227_v30  ;;  %v1331_v50 = vadd.f32 %v1934_v54, %v1330_v5  ;;  %v1339_v10 = vor.u32 1.1754944e-38, %v1338_v12  ;;  %vm1334_vm1 = vmor %vm1332_vm14, %vm1333_vm13 }
 0x366   :  { %1608 = vst.msk [vmem:[%s3424_s6 + $0x20] sm:$0xff] %vm61_vm0, %v1592_v15  ;;  %v1942_v62 = vpop.eup %1941  ;;  %1947 = vpow2.f32 %v1204_v14  ;;  %v1069_v48 = vmax.f32 %v1053_v6, %v2704_v29  ;;  %vm1347_vm2 = vweird.f32 %v2963_v11  ;;  %vm3017_vm5 = vcmp.eq.f32.partialorder %v1351_v33, 8.507059e+37 }
 0x367   :  { %v1343_v32 = vmul.f32 %v1942_v62, %v2963_v11  ;;  %1949 = vrcp.f32 %v3011_v47  ;;  %v3022_v39 = vpop.eup %1943  ;;  %v1335_v24 = vsel %vm1334_vm1, %v1934_v54, %v1331_v50  ;;  %v1354_v45 = vor.u32 1.1754944e-38, %v1353_v18 }
 0x368   :  { %v1085_v36 = vsub.f32 %v2668_v2, %v1069_v48  ;;  %v3026_v8 = vmax.f32 %v1054_v43, %v2714_v7  ;;  %v1340_v17 = vsel %vm3006_vm15, %v1339_v10, %v1335_v24  ;;  %vm1348_vm6 = vweird.f32 %v1942_v62 }
 0x369   :  { %v1344_v19 = vsub.f32 1.0, %v1343_v32  ;;  %v1366_v37 = vand.u32 2147483647, %v3011_v47  ;;  %v1341_v40 = vmul.f32 %v2899_v38, %v1340_v17  ;;  %v1497_v51 = vmul.f32 %v2904_v56, %v1340_v17  ;;  %vm1349_vm9 = vmor %vm1347_vm2, %vm1348_vm6 }
 0x36a   :  { %v3031_v21 = vpop.eup %1945  ;;  %v1513_v54 = vmul.f32 %v2927_v41, %v1340_v17  ;;  %v1133_v2 = vsub.f32 %v2985_v9, %v1069_v48  ;;  %v1368_v44 = vand.u32 2147483648, %v3011_v47  ;;  %v1110_v28 = vmul.f32 1.442695, %v1085_v36 }
 0x36b   :  { %v1345_v4 = vmul.f32 %v1942_v62, %v1344_v19  ;;  %v1228_v52 = vadd.f32 %v3031_v21, %v3022_v39  ;;  %v3569_v16 = vmax.f32 %v2294_v13, 0.0  ;;  %v3570_v38 = vmax.f32 %v2465_v58, 0.0 }
 0x36c   :  { %v3040_v42 = vpop.eup %1947  ;;  %v1626_v56 = vsel %vm1620_vm3, %v1341_v40, %v1497_v51  ;;  %vm1362_vm7 = vweird.f32 %v3011_v47  ;;  %v1181_v41 = vsub.f32 %v2704_v29, %v1069_v48  ;;  %v3571_v23 = vmax.f32 %v2321_v26, 0.0 }
 0x36d   :  { %v1529_v49 = vmul.f32 %v1341_v40, %v3569_v16  ;;  %v1545_v25 = vmul.f32 %v1497_v51, %v3570_v38  ;;  %v1950_v55 = vpop.eup %1949  ;;  %v1643_v3 = vsel %vm1637_vm4, %v1626_v56, %v1513_v54  ;;  %v1346_v12 = vadd.f32 %v1942_v62, %v1345_v4  ;;  %v3578_v40 = vld [vmem:[#allocation33_spill] sm:$0xff] }
 0x36e   :  { %v1577_v63 = vmul.f32 %v1513_v54, %v3571_v23  ;;  %v3053_v9 = vadd.f32 %v3040_v42, %v1228_v52  ;;  %1660 = vst.msk [vmem:[%s3425_s7 + $0x28] sm:$0xff] %vm1654_vm8, %v1643_v3  ;;  %v1358_v58 = vmul.f32 %v1950_v55, %v3011_v47  ;;  %1951 = vpow2.f32 %v1110_v28 }
 0x36f   :  { %v1561_v13 = vadd.f32 %v1545_v25, %v1529_v49  ;;  %v1158_v26 = vmul.f32 1.442695, %v1133_v2  ;;  %v1350_v29 = vsel %vm1349_vm9, %v1942_v62, %v1346_v12  ;;  %vm3063_vm10 = vcmp.eq.f32.partialorder %v1366_v37, 8.507059e+37  ;;  %v828_v62 = vpop.xlane.xlu0 %827  ;;  %v3579_v25 = vld [vmem:[#allocation38_spill] sm:$0xff] }
 0x370   :  { %v1369_v35 = vor.u32 1.1754944e-38, %v1368_v44  ;;  %1953 = vrcp.f32 %v3053_v9  ;;  %v1355_v15 = vsel %vm3017_vm5, %v1354_v45, %v1350_v29  ;;  %v1359_v33 = vsub.f32 1.0, %v1358_v58 }
 0x371   :  { %v1593_v14 = vadd.f32 %v1577_v63, %v1561_v13  ;;  %vm1363_vm11 = vweird.f32 %v1950_v55  ;;  %v1356_v11 = vmul.f32 %v2943_v53, %v1355_v15  ;;  %v1498_v18 = vmul.f32 %v2952_v60, %v1355_v15  ;;  %v3583_v63 = vld [vmem:[#allocation24_spill] sm:$0xff] }
 0x372   :  { %v1514_v30 = vmul.f32 %v2954_v22, %v1355_v15  ;;  %v1381_v5 = vand.u32 2147483647, %v3053_v9  ;;  %v1360_v6 = vmul.f32 %v1950_v55, %v1359_v33  ;;  %v1383_v43 = vand.u32 2147483648, %v3053_v9  ;;  %v3576_v22 = vld [vmem:[#allocation10_spill] sm:$0xff]  ;;  %vm1364_vm12 = vmor %vm1362_vm7, %vm1363_vm11  ;;  %v3104_v4 = vpop.xlane.xlu1 %830  ;;  %v3585_v13 = vld [vmem:[#allocation12_spill] sm:$0xff] }
 0x373   :  { %1609 = vst.msk [vmem:[%s3424_s6 + $0x28] sm:$0xff] %vm61_vm0, %v1593_v14  ;;  %1955 = vpow2.f32 %v1158_v26  ;;  %v1206_v1 = vmul.f32 1.442695, %v1181_v41  ;;  %v3574_v50 = vmax.f32 %v2218_v46, 0.0  ;;  %v3575_v60 = vmax.f32 %v2475_v20, 0.0  ;;  %v3580_v41 = vld [vmem:[#allocation34_spill] sm:$0xff] }
 0x374   :  { %v3577_v48 = vmax.f32 %v3576_v22, 0.0  ;;  %v1627_v57 = vsel %vm1620_vm3, %v1356_v11, %v1498_v18  ;;  %v3086_v24 = vpop.eup %1951  ;;  %v1361_v36 = vadd.f32 %v1950_v55, %v1360_v6  ;;  %v1086_v17 = vsub.f32 %v2671_v59, %v3026_v8 }
 0x375   :  { %v1530_v53 = vmul.f32 %v1356_v11, %v3574_v50  ;;  %v1546_v10 = vmul.f32 %v1498_v18, %v3575_v60  ;;  %v1644_v45 = vsel %vm1637_vm4, %v1627_v57, %v1514_v30  ;;  %1957 = vpow2.f32 %v1206_v1 }
 0x376   :  { %v1578_v32 = vmul.f32 %v1514_v30, %v3577_v48  ;;  %v1954_v19 = vpop.eup %1953  ;;  %1661 = vst.msk [vmem:[%s3425_s7 + $0x30] sm:$0xff] %vm1654_vm8, %v1644_v45  ;;  %v1134_v20 = vsub.f32 %v2995_v31, %v3026_v8  ;;  %v1182_v37 = vsub.f32 %v2714_v7, %v3026_v8  ;;  %v1055_v51 = vmax.f32 %v3578_v40, %v828_v62 }
 0x377   :  { %v1562_v46 = vadd.f32 %v1546_v10, %v1530_v53  ;;  %v1365_v59 = vsel %vm1364_vm12, %v1950_v55, %v1361_v36  ;;  %v1373_v54 = vmul.f32 %v1954_v19, %v3053_v9  ;;  %vm1378_vm13 = vweird.f32 %v1954_v19 }
 0x378   :  { %v1112_v2 = vmul.f32 1.442695, %v1086_v17  ;;  %v1370_v47 = vsel %vm3063_vm10, %v1369_v35, %v1365_v59  ;;  %v1160_v52 = vmul.f32 1.442695, %v1134_v20  ;;  %v1208_v28 = vmul.f32 1.442695, %v1182_v37 }
 0x379   :  { %v1594_v44 = vadd.f32 %v1578_v32, %v1562_v46  ;;  %v3108_v16 = vpop.eup %1955  ;;  %v1371_v31 = vmul.f32 %v2976_v34, %v1370_v47  ;;  %v1499_v7 = vmul.f32 %v2987_v0, %v1370_v47  ;;  %v1515_v8 = vmul.f32 %v2989_v61, %v1370_v47  ;;  %v3581_v0 = vld [vmem:[#allocation5_spill] sm:$0xff]  ;;  %v3588_v20 = vld [vmem:[#allocation6_spill] sm:$0xff] }
 0x37a   :  { %v1374_v49 = vsub.f32 1.0, %v1373_v54  ;;  %v1229_v38 = vadd.f32 %v3108_v16, %v3086_v24  ;;  %1959 = vpow2.f32 %v1112_v2  ;;  %v1071_v56 = vmax.f32 %v1055_v51, %v3579_v25  ;;  %v3592_v54 = vld [vmem:[#allocation14_spill] sm:$0xff] }
 0x37b   :  { %1610 = vst.msk [vmem:[%s3424_s6 + $0x30] sm:$0xff] %vm61_vm0, %v1594_v44  ;;  %v1056_v55 = vmax.f32 %v3580_v41, %v3104_v4  ;;  %v3122_v34 = vpop.eup %1957  ;;  %v3582_v23 = vmax.f32 %v3581_v0, 0.0  ;;  %v3584_v3 = vmax.f32 %v3583_v63, 0.0  ;;  %v3586_v58 = vmax.f32 %v3585_v13, 0.0 }
 0x37c   :  { %v1628_v29 = vsel %vm1620_vm3, %v1371_v31, %v1499_v7  ;;  %v1375_v35 = vmul.f32 %v1954_v19, %v1374_v49  ;;  %v3133_v14 = vadd.f32 %v3122_v34, %v1229_v38  ;;  %1961 = vpow2.f32 %v1160_v52 }
 0x37d   :  { %v1531_v61 = vmul.f32 %v1371_v31, %v3582_v23  ;;  %v1547_v12 = vmul.f32 %v1499_v7, %v3584_v3  ;;  %v1579_v26 = vmul.f32 %v1515_v8, %v3586_v58  ;;  %v1645_v27 = vsel %vm1637_vm4, %v1628_v29, %v1515_v8  ;;  %v3594_v58 = vld [vmem:[#allocation35_spill] sm:$0xff] }
 0x37e   :  { %1662 = vst.msk [vmem:[%s3425_s7 + $0x38] sm:$0xff] %vm1654_vm8, %v1645_v27  ;;  %1963 = vpow2.f32 %v1208_v28  ;;  %v1087_v33 = vsub.f32 %v3578_v40, %v1071_v56  ;;  %v1135_v11 = vsub.f32 %v828_v62, %v1071_v56  ;;  %v1376_v18 = vadd.f32 %v1954_v19, %v1375_v35  ;;  %v3587_v62 = vld [vmem:[#allocation39_spill] sm:$0xff] }
 0x37f   :  { %v1563_v15 = vadd.f32 %v1547_v12, %v1531_v61  ;;  %vm1377_vm14 = vweird.f32 %v3053_v9  ;;  %1965 = vrcp.f32 %v3133_v14  ;;  %v1384_v6 = vor.u32 1.1754944e-38, %v1383_v43  ;;  %v3192_v61 = vpop.xlane.xlu2 %833 }
 0x380   :  { %vm1379_vm15 = vmor %vm1377_vm14, %vm1378_vm13  ;;  %v1114_v1 = vmul.f32 1.442695, %v1087_v33  ;;  %v1162_v50 = vmul.f32 1.442695, %v1135_v11  ;;  %v3143_v53 = vpop.eup %1959  ;;  %vm1382_vm1 = vcmp.eq.f32.partialorder %v1381_v5, 8.507059e+37  ;;  %v1183_v10 = vsub.f32 %v3579_v25, %v1071_v56 }
 0x381   :  { %v1595_v30 = vadd.f32 %v1579_v26, %v1563_v15  ;;  %v1380_v60 = vsel %vm1379_vm15, %v1954_v19, %v1376_v18  ;;  %v1072_v22 = vmax.f32 %v1056_v55, %v3587_v62  ;;  %v3589_v37 = vmax.f32 %v3588_v20, 0.0 }
 0x382   :  { %v1385_v48 = vsel %vm1382_vm1, %v1384_v6, %v1380_v60  ;;  %1967 = vpow2.f32 %v1114_v1  ;;  %v3153_v43 = vpop.eup %1961  ;;  %v1210_v36 = vmul.f32 1.442695, %v1183_v10  ;;  %v3169_v59 = vpop.xlane.xlu0 %836  ;;  %v3593_v2 = vmax.f32 %v3592_v54, 0.0 }
 0x383   :  { %1611 = vst.msk [vmem:[%s3424_s6 + $0x38] sm:$0xff] %vm61_vm0, %v1595_v30  ;;  %v1386_v32 = vmul.f32 %v3022_v39, %v1385_v48  ;;  %v1500_v57 = vmul.f32 %v3031_v21, %v1385_v48  ;;  %v1516_v9 = vmul.f32 %v3040_v42, %v1385_v48  ;;  %1969 = vpow2.f32 %v1162_v50  ;;  %v3590_v39 = vld [vmem:[#allocation25_spill] sm:$0xff] }
 0x384   :  { %v3158_v5 = vpop.eup %1963  ;;  %v1230_v45 = vadd.f32 %v3153_v43, %v3143_v53  ;;  %v1088_v17 = vsub.f32 %v3580_v41, %v1072_v22  ;;  %v1136_v19 = vsub.f32 %v3104_v4, %v1072_v22  ;;  %v3591_v51 = vmax.f32 %v3590_v39, 0.0  ;;  %v3595_v48 = vld [vmem:[#allocation37_spill] sm:$0xff] }
 0x385   :  { %v1966_v46 = vpop.eup %1965  ;;  %v1532_v40 = vmul.f32 %v1386_v32, %v3589_v37  ;;  %v1629_v42 = vsel %vm1620_vm3, %v1386_v32, %v1500_v57  ;;  %v1580_v44 = vmul.f32 %v1516_v9, %v3593_v2  ;;  %1971 = vpow2.f32 %v1210_v36  ;;  %v3598_v36 = vld [vmem:[#allocation26_spill] sm:$0xff] }
 0x386   :  { %v1548_v21 = vmul.f32 %v1500_v57, %v3591_v51  ;;  %v1646_v47 = vsel %vm1637_vm4, %v1629_v42, %v1516_v9  ;;  %v1388_v52 = vmul.f32 %v1966_v46, %v3133_v14  ;;  %v3176_v4 = vadd.f32 %v3158_v5, %v1230_v45  ;;  %v3596_v57 = vld [vmem:[#allocation7_spill] sm:$0xff] }
 0x387   :  { %1663 = vst.msk [vmem:[%s3425_s7 + $0x40] sm:$0xff] %vm1654_vm8, %v1646_v47  ;;  %v1116_v31 = vmul.f32 1.442695, %v1088_v17  ;;  %v1164_v7 = vmul.f32 1.442695, %v1136_v19  ;;  %v1398_v41 = vand.u32 2147483648, %v3133_v14  ;;  %v1184_v55 = vsub.f32 %v3587_v62, %v1072_v22 }
 0x388   :  { %v1564_v28 = vadd.f32 %v1548_v21, %v1532_v40  ;;  %v3182_v8 = vpop.eup %1967  ;;  %v1389_v49 = vsub.f32 1.0, %v1388_v52  ;;  %1973 = vrcp.f32 %v3176_v4  ;;  %v1396_v56 = vand.u32 2147483647, %v3133_v14  ;;  %v3600_v19 = vld [vmem:[#allocation16_spill] sm:$0xff]  ;;  %v1043_v52 = vpop.xlane.xlu2 %1042 }
 0x389   :  { %v3185_v38 = vpop.eup %1969  ;;  %vm1393_vm2 = vweird.f32 %v1966_v46  ;;  %1975 = vpow2.f32 %v1116_v31  ;;  %v1212_v63 = vmul.f32 1.442695, %v1184_v55  ;;  %vm1392_vm5 = vweird.f32 %v3133_v14 }
 0x38a   :  { %v1596_v25 = vadd.f32 %v1580_v44, %v1564_v28  ;;  %v1390_v0 = vmul.f32 %v1966_v46, %v1389_v49  ;;  %v1231_v23 = vadd.f32 %v3185_v38, %v3182_v8  ;;  %1977 = vpow2.f32 %v1164_v7  ;;  %vm1394_vm6 = vmor %vm1392_vm5, %vm1393_vm2  ;;  %v1037_v29 = vpop.xlane.xlu0 %1036  ;;  %v3208_v11 = vpop.xlane.xlu1 %839 }
 0x38b   :  { %v3199_v12 = vpop.eup %1971  ;;  %vm1397_vm7 = vcmp.eq.f32.partialorder %v1396_v56, 8.507059e+37  ;;  %v1399_v13 = vor.u32 1.1754944e-38, %v1398_v41  ;;  %v1057_v26 = vmax.f32 %v3594_v58, %v3192_v61  ;;  %vm1407_vm9 = vweird.f32 %v3176_v4 }
 0x38c   :  { %1612 = vst.msk [vmem:[%s3424_s6 + $0x40] sm:$0xff] %vm61_vm0, %v1596_v25  ;;  %v1391_v3 = vadd.f32 %v1966_v46, %v1390_v0  ;;  %v1411_v15 = vand.u32 2147483647, %v3176_v4  ;;  %v3206_v33 = vadd.f32 %v3199_v12, %v1231_v23  ;;  %1979 = vpow2.f32 %v1212_v63  ;;  %v3602_v0 = vld [vmem:[#allocation36_spill] sm:$0xff] }
 0x38d   :  { %v1073_v30 = vmax.f32 %v1057_v26, %v1037_v29  ;;  %v1413_v22 = vand.u32 2147483648, %v3176_v4  ;;  %v1059_v32 = vmax.f32 %v3595_v48, %v3208_v11  ;;  %v3597_v9 = vmax.f32 %v3596_v57, 0.0  ;;  %v3609_v57 = vld [vmem:[#allocation18_spill] sm:$0xff] }
 0x38e   :  { %v1974_v27 = vpop.eup %1973  ;;  %v1395_v35 = vsel %vm1394_vm6, %v1966_v46, %v1391_v3  ;;  %1981 = vrcp.f32 %v3206_v33  ;;  %v3601_v46 = vmax.f32 %v3600_v19, 0.0  ;;  %v1428_v39 = vand.u32 2147483648, %v3206_v33 }
 0x38f   :  { %v1400_v14 = vsel %vm1397_vm7, %v1399_v13, %v1395_v35  ;;  %v1403_v18 = vmul.f32 %v1974_v27, %v3176_v4  ;;  %v3211_v6 = vpop.eup %1975  ;;  %vm1408_vm10 = vweird.f32 %v1974_v27  ;;  %v1089_v42 = vsub.f32 %v3594_v58, %v1073_v30 }
 0x390   :  { %v1401_v1 = vmul.f32 %v3086_v24, %v1400_v14  ;;  %v1501_v50 = vmul.f32 %v3108_v16, %v1400_v14  ;;  %v1517_v60 = vmul.f32 %v3122_v34, %v1400_v14  ;;  %v3217_v10 = vpop.eup %1977  ;;  %v3599_v24 = vmax.f32 %v3598_v36, 0.0  ;;  %vm1409_vm12 = vmor %vm1407_vm9, %vm1408_vm10 }
 0x391   :  { %v1404_v62 = vsub.f32 1.0, %v1403_v18  ;;  %v1426_v34 = vand.u32 2147483647, %v3206_v33  ;;  %v1232_v21 = vadd.f32 %v3217_v10, %v3211_v6  ;;  %v1137_v54 = vsub.f32 %v3192_v61, %v1073_v30 }
 0x392   :  { %v1533_v45 = vmul.f32 %v1401_v1, %v3597_v9  ;;  %v1549_v17 = vmul.f32 %v1501_v50, %v3599_v24  ;;  %v1630_v16 = vsel %vm1620_vm3, %v1401_v1, %v1501_v50  ;;  %v1581_v20 = vmul.f32 %v1517_v60, %v3601_v46  ;;  %v3240_v2 = vpop.eup %1979 }
 0x393   :  { %v1647_v37 = vsel %vm1637_vm4, %v1630_v16, %v1517_v60  ;;  %v1405_v40 = vmul.f32 %v1974_v27, %v1404_v62  ;;  %vm1412_vm11 = vcmp.eq.f32.partialorder %v1411_v15, 8.507059e+37  ;;  %v1414_v47 = vor.u32 1.1754944e-38, %v1413_v22  ;;  %v3605_v15 = vld [vmem:[#allocation8_spill] sm:$0xff]  ;;  %v1040_v62 = vpop.xlane.xlu1 %1039 }
 0x394   :  { %v1565_v51 = vadd.f32 %v1549_v17, %v1533_v45  ;;  %1664 = vst.msk [vmem:[%s3425_s7 + $0x48] sm:$0xff] %vm1654_vm8, %v1647_v37  ;;  %v1185_v28 = vsub.f32 %v1037_v29, %v1073_v30  ;;  %v1982_v31 = vpop.eup %1981  ;;  %v3246_v49 = vadd.f32 %v3240_v2, %v1232_v21  ;;  %v1118_v25 = vmul.f32 1.442695, %v1089_v42  ;;  %v3607_v30 = vld [vmem:[#allocation27_spill] sm:$0xff] }
 0x395   :  { %v1406_v44 = vadd.f32 %v1974_v27, %v1405_v40  ;;  %v1075_v56 = vmax.f32 %v1059_v32, %v1043_v52  ;;  %v1418_v55 = vmul.f32 %v1982_v31, %v3206_v33  ;;  %vm1422_vm13 = vweird.f32 %v3206_v33 }
 0x396   :  { %v1597_v7 = vadd.f32 %v1581_v20, %v1565_v51  ;;  %v1058_v23 = vmax.f32 %v3602_v0, %v3169_v59  ;;  %vm3256_vm14 = vcmp.eq.f32.partialorder %v1426_v34, 8.507059e+37  ;;  %v1429_v63 = vor.u32 1.1754944e-38, %v1428_v39 }
 0x397   :  { %v1410_v41 = vsel %vm1409_vm12, %v1974_v27, %v1406_v44  ;;  %1983 = vrcp.f32 %v3246_v49  ;;  %v1166_v3 = vmul.f32 1.442695, %v1137_v54  ;;  %v1419_v29 = vsub.f32 1.0, %v1418_v55 }
 0x398   :  { %1613 = vst.msk [vmem:[%s3424_s6 + $0x48] sm:$0xff] %vm61_vm0, %v1597_v7  ;;  %v1415_v4 = vsel %vm1412_vm11, %v1414_v47, %v1410_v41  ;;  %vm1423_vm15 = vweird.f32 %v1982_v31  ;;  %1985 = vpow2.f32 %v1118_v25  ;;  %v1214_v27 = vmul.f32 1.442695, %v1185_v28  ;;  %v3611_v41 = vld [vmem:[#allocation9_spill] sm:$0xff] }
 0x399   :  { %v1416_v13 = vmul.f32 %v3143_v53, %v1415_v4  ;;  %v1502_v58 = vmul.f32 %v3153_v43, %v1415_v4  ;;  %v1518_v26 = vmul.f32 %v3158_v5, %v1415_v4  ;;  %v1091_v35 = vsub.f32 %v3595_v48, %v1075_v56  ;;  %vm1424_vm2 = vmor %vm1422_vm13, %vm1423_vm15 }
 0x39a   :  { %v3606_v14 = vmax.f32 %v3605_v15, 0.0  ;;  %v3608_v1 = vmax.f32 %v3607_v30, 0.0  ;;  %v1443_v53 = vand.u32 2147483648, %v3246_v49  ;;  %v1420_v5 = vmul.f32 %v1982_v31, %v1419_v29 }
 0x39b   :  { %v1631_v60 = vsel %vm1620_vm3, %v1416_v13, %v1502_v58  ;;  %v1441_v22 = vand.u32 2147483647, %v3246_v49  ;;  %1987 = vpow2.f32 %v1166_v3  ;;  %v3610_v48 = vmax.f32 %v3609_v57, 0.0 }
 0x39c   :  { %v1534_v18 = vmul.f32 %v1416_v13, %v3606_v14  ;;  %v1550_v50 = vmul.f32 %v1502_v58, %v3608_v1  ;;  %v1648_v43 = vsel %vm1637_vm4, %v1631_v60, %v1518_v26  ;;  %vm1437_vm1 = vweird.f32 %v3246_v49 }
 0x39d   :  { %v1582_v9 = vmul.f32 %v1518_v26, %v3610_v48  ;;  %1665 = vst.msk [vmem:[%s3425_s7 + $0x50] sm:$0xff] %vm1654_vm8, %v1648_v43  ;;  %v1122_v45 = vmul.f32 1.442695, %v1091_v35  ;;  %v1139_v36 = vsub.f32 %v3208_v11, %v1075_v56  ;;  %v1984_v24 = vpop.eup %1983  ;;  %v1421_v17 = vadd.f32 %v1982_v31, %v1420_v5  ;;  %v3619_v5 = vld [vmem:[#allocation29_spill] sm:$0xff] }
 0x39e   :  { %v1566_v32 = vadd.f32 %v1550_v50, %v1534_v18  ;;  %1989 = vpow2.f32 %v1214_v27  ;;  %v1187_v16 = vsub.f32 %v1043_v52, %v1075_v56  ;;  %v1074_v34 = vmax.f32 %v1058_v23, %v1040_v62  ;;  %v3285_v37 = vpop.eup %1985 }
 0x39f   :  { %v1433_v46 = vmul.f32 %v1984_v24, %v3246_v49  ;;  %v1444_v20 = vor.u32 1.1754944e-38, %v1443_v53  ;;  %1991 = vpow2.f32 %v1122_v45  ;;  %v1425_v40 = vsel %vm1424_vm2, %v1982_v31, %v1421_v17  ;;  %v3617_v53 = vld [vmem:[#allocation11_spill] sm:$0xff]  ;;  %v3621_v45 = vld [vmem:[#allocation20_spill] sm:$0xff] }
 0x3a0   :  { %v1598_v19 = vadd.f32 %v1582_v9, %v1566_v32  ;;  %v1170_v39 = vmul.f32 1.442695, %v1139_v36  ;;  %v1218_v51 = vmul.f32 1.442695, %v1187_v16  ;;  %v1090_v11 = vsub.f32 %v3602_v0, %v1074_v34  ;;  %v3613_v0 = vld [vmem:[#allocation28_spill] sm:$0xff] }
 0x3a1   :  { %v1430_v33 = vsel %vm3256_vm14, %v1429_v63, %v1425_v40  ;;  %v1434_v21 = vsub.f32 1.0, %v1433_v46  ;;  %v1138_v42 = vsub.f32 %v3169_v59, %v1074_v34  ;;  %v1186_v54 = vsub.f32 %v1040_v62, %v1074_v34  ;;  %v3295_v44 = vpop.eup %1987 }
 0x3a2   :  { %1614 = vst.msk [vmem:[%s3424_s6 + $0x50] sm:$0xff] %vm61_vm0, %v1598_v19  ;;  %v1431_v47 = vmul.f32 %v3182_v8, %v1430_v33  ;;  %v1503_v52 = vmul.f32 %v3185_v38, %v1430_v33  ;;  %v1519_v28 = vmul.f32 %v3199_v12, %v1430_v33  ;;  %1993 = vpow2.f32 %v1170_v39  ;;  %v3615_v12 = vld [vmem:[#allocation19_spill] sm:$0xff] }
 0x3a3   :  { %v1435_v31 = vmul.f32 %v1984_v24, %v1434_v21  ;;  %vm1438_vm5 = vweird.f32 %v1984_v24  ;;  %v1233_v7 = vadd.f32 %v3295_v44, %v3285_v37  ;;  %v1120_v25 = vmul.f32 1.442695, %v1090_v11 }
 0x3a4   :  { %v3302_v56 = vpop.eup %1989  ;;  %v3612_v59 = vmax.f32 %v3611_v41, 0.0  ;;  %v3614_v23 = vmax.f32 %v3613_v0, 0.0  ;;  %v1632_v8 = vsel %vm1620_vm3, %v1431_v47, %v1503_v52  ;;  %1995 = vpow2.f32 %v1218_v51  ;;  %vm1439_vm6 = vmor %vm1437_vm1, %vm1438_vm5 }
 0x3a5   :  { %v3309_v38 = vpop.eup %1991  ;;  %v3616_v61 = vmax.f32 %v3615_v12, 0.0  ;;  %v1649_v3 = vsel %vm1637_vm4, %v1632_v8, %v1519_v28  ;;  %v1436_v13 = vadd.f32 %v1984_v24, %v1435_v31  ;;  %v1249_v58 = vadd.f32 %v3302_v56, %v1233_v7  ;;  %v3625_v12 = vld [vmem:[#allocation30_spill] sm:$0xff] }
 0x3a6   :  { %v1535_v55 = vmul.f32 %v1431_v47, %v3612_v59  ;;  %v1551_v4 = vmul.f32 %v1503_v52, %v3614_v23  ;;  %1666 = vst.msk [vmem:[%s3425_s7 + $0x58] sm:$0xff] %vm1654_vm8, %v1649_v3  ;;  %1997 = vpow2.f32 %v1120_v25  ;;  %v1168_v29 = vmul.f32 1.442695, %v1138_v42  ;;  %v3623_v23 = vld [vmem:[#allocation13_spill] sm:$0xff] }
 0x3a7   :  { %v1583_v63 = vmul.f32 %v1519_v28, %v3616_v61  ;;  %v1216_v27 = vmul.f32 1.442695, %v1186_v54  ;;  %v1440_v35 = vsel %vm1439_vm6, %v1984_v24, %v1436_v13  ;;  %vm1442_vm7 = vcmp.eq.f32.partialorder %v1441_v22, 8.507059e+37 }
 0x3a8   :  { %v1567_v26 = vadd.f32 %v1551_v4, %v1535_v55  ;;  %1999 = vrcp.f32 %v1249_v58  ;;  %v3322_v15 = vpop.eup %1993  ;;  %v1445_v18 = vsel %vm1442_vm7, %v1444_v20, %v1440_v35  ;;  %v3618_v62 = vmax.f32 %v3617_v53, 0.0 }
 0x3a9   :  { %2001 = vpow2.f32 %v1168_v29  ;;  %v1446_v30 = vmul.f32 %v3211_v6, %v1445_v18  ;;  %v1504_v1 = vmul.f32 %v3217_v10, %v1445_v18  ;;  %v1520_v50 = vmul.f32 %v3240_v2, %v1445_v18 }
 0x3aa   :  { %v1599_v14 = vadd.f32 %v1583_v63, %v1567_v26  ;;  %v3327_v60 = vpop.eup %1995  ;;  %v1235_v49 = vadd.f32 %v3322_v15, %v3309_v38  ;;  %2003 = vpow2.f32 %v1216_v27  ;;  %v3620_v6 = vmax.f32 %v3619_v5, 0.0  ;;  %v3629_v5 = vld [vmem:[#allocation17_spill] sm:$0xff] }
 0x3ab   :  { %v1536_v43 = vmul.f32 %v1446_v30, %v3618_v62  ;;  %v1633_v10 = vsel %vm1620_vm3, %v1446_v30, %v1504_v1  ;;  %v3622_v36 = vmax.f32 %v3621_v45, 0.0  ;;  %v1458_v40 = vand.u32 2147483648, %v1249_v58 }
 0x3ac   :  { %1615 = vst.msk [vmem:[%s3424_s6 + $0x58] sm:$0xff] %vm61_vm0, %v1599_v14  ;;  %v1552_v22 = vmul.f32 %v1504_v1, %v3620_v6  ;;  %v3340_v2 = vpop.eup %1997  ;;  %v1650_v32 = vsel %vm1637_vm4, %v1633_v10, %v1520_v50  ;;  %v1251_v57 = vadd.f32 %v3327_v60, %v1235_v49  ;;  %v1456_v11 = vand.u32 2147483647, %v1249_v58  ;;  %v3631_v10 = vld [vmem:[#allocation32_spill] sm:$0xff] }
 0x3ad   :  { %v1584_v24 = vmul.f32 %v1520_v50, %v3622_v36  ;;  %1667 = vst.msk [vmem:[%s3425_s7 + $0x60] sm:$0xff] %vm1654_vm8, %v1650_v32  ;;  %vm1452_vm10 = vweird.f32 %v1249_v58  ;;  %v1459_v42 = vor.u32 1.1754944e-38, %v1458_v40  ;;  %v3624_v4 = vmax.f32 %v3623_v23, 0.0 }
 0x3ae   :  { %v2000_v48 = vpop.eup %1999  ;;  %v1568_v9 = vadd.f32 %v1552_v22, %v1536_v43  ;;  %2005 = vrcp.f32 %v1251_v57  ;;  %vm1457_vm12 = vcmp.eq.f32.partialorder %v1456_v11, 8.507059e+37  ;;  %v1488_v41 = vand.u32 2147483648, %v1251_v57 }
 0x3af   :  { %v3350_v17 = vpop.eup %2001  ;;  %v1448_v16 = vmul.f32 %v2000_v48, %v1249_v58  ;;  %vm1453_vm9 = vweird.f32 %v2000_v48  ;;  %v1486_v0 = vand.u32 2147483647, %v1251_v57  ;;  %v3626_v61 = vmax.f32 %v3625_v12, 0.0 }
 0x3b0   :  { %v1600_v34 = vadd.f32 %v1584_v24, %v1568_v9  ;;  %v1234_v19 = vadd.f32 %v3350_v17, %v3340_v2  ;;  %v3354_v46 = vpop.eup %2003  ;;  %vm1454_vm11 = vmor %vm1452_vm10, %vm1453_vm9  ;;  %vm1482_vm14 = vweird.f32 %v1251_v57  ;;  %v1489_v27 = vor.u32 1.1754944e-38, %v1488_v41  ;;  %v3633_v9 = vld [vmem:[#allocation23_spill] sm:$0xff] }
 0x3b1   :  { %v1449_v20 = vsub.f32 1.0, %v1448_v16  ;;  %vm1487_vm1 = vcmp.eq.f32.partialorder %v1486_v0, 8.507059e+37  ;;  %v3630_v6 = vmax.f32 %v3629_v5, 0.0  ;;  %v3632_v32 = vmax.f32 %v3631_v10, 0.0 }
 0x3b2   :  { %1616 = vst.msk [vmem:[%s3424_s6 + $0x60] sm:$0xff] %vm61_vm0, %v1600_v34  ;;  %v1250_v39 = vadd.f32 %v3354_v46, %v1234_v19  ;;  %v3634_v45 = vmax.f32 %v3633_v9, 0.0 }
 0x3b3   :  { %v1450_v51 = vmul.f32 %v2000_v48, %v1449_v20 }
 0x3b4   :  { %2007 = vrcp.f32 %v1250_v39  ;;  %v2006_v33 = vpop.eup %2005  ;;  %v1473_v1 = vand.u32 2147483648, %v1250_v39  ;;  %v1471_v43 = vand.u32 2147483647, %v1250_v39  ;;  %vm1467_vm5 = vweird.f32 %v1250_v39 }
 0x3b5   :  { %v1451_v21 = vadd.f32 %v2000_v48, %v1450_v51  ;;  %v1478_v54 = vmul.f32 %v2006_v33, %v1251_v57  ;;  %vm1483_vm13 = vweird.f32 %v2006_v33  ;;  %v3635_v51 = vld [vmem:[#allocation15_spill] sm:$0xff] }
 0x3b6   :  { %vm1484_vm15 = vmor %vm1482_vm14, %vm1483_vm13  ;;  %v1474_v24 = vor.u32 1.1754944e-38, %v1473_v1  ;;  %vm1472_vm7 = vcmp.eq.f32.partialorder %v1471_v43, 8.507059e+37  ;;  %v3636_v11 = vmax.f32 %v3635_v51, 0.0 }
 0x3b7   :  { %v1455_v47 = vsel %vm1454_vm11, %v2000_v48, %v1451_v21  ;;  %v1479_v28 = vsub.f32 1.0, %v1478_v54  ;;  %v3637_v21 = vld [vmem:[#allocation31_spill] sm:$0xff] }
 0x3b8   :  { %v1460_v52 = vsel %vm1457_vm12, %v1459_v42, %v1455_v47  ;;  %v3638_v42 = vmax.f32 %v3637_v21, 0.0 }
 0x3b9   :  { %v1461_v31 = vmul.f32 %v3285_v37, %v1460_v52  ;;  %v1505_v7 = vmul.f32 %v3295_v44, %v1460_v52  ;;  %v1521_v25 = vmul.f32 %v3302_v56, %v1460_v52  ;;  %v1480_v55 = vmul.f32 %v2006_v33, %v1479_v28  ;;  %v3627_v56 = vld [vmem:[#allocation21_spill] sm:$0xff]  ;;  %v3639_v28 = vld [vmem:[#allocation22_spill] sm:$0xff] }
 0x3ba   :  { %v2008_v59 = vpop.eup %2007  ;;  %v3628_v26 = vmax.f32 %v3627_v56, 0.0 }
 0x3bb   :  { %v1537_v8 = vmul.f32 %v1461_v31, %v3624_v4  ;;  %v1553_v63 = vmul.f32 %v1505_v7, %v3626_v61  ;;  %v1634_v3 = vsel %vm1620_vm3, %v1461_v31, %v1505_v7  ;;  %v1481_v37 = vadd.f32 %v2006_v33, %v1480_v55 }
 0x3bc   :  { %v1651_v13 = vsel %vm1637_vm4, %v1634_v3, %v1521_v25  ;;  %v1463_v44 = vmul.f32 %v2008_v59, %v1250_v39  ;;  %v1585_v29 = vmul.f32 %v1521_v25, %v3628_v26  ;;  %vm1468_vm2 = vweird.f32 %v2008_v59 }
 0x3bd   :  { %v1569_v58 = vadd.f32 %v1553_v63, %v1537_v8  ;;  %1668 = vst.msk [vmem:[%s3425_s7 + $0x68] sm:$0xff] %vm1654_vm8, %v1651_v13  ;;  %v1485_v35 = vsel %vm1484_vm15, %v2006_v33, %v1481_v37  ;;  %vm1469_vm6 = vmor %vm1467_vm5, %vm1468_vm2 }
 0x3be   :  { %v1464_v14 = vsub.f32 1.0, %v1463_v44  ;;  %v1490_v30 = vsel %vm1487_vm1, %v1489_v27, %v1485_v35 }
 0x3bf   :  { %v1601_v18 = vadd.f32 %v1585_v29, %v1569_v58  ;;  %v1491_v50 = vmul.f32 %v3309_v38, %v1490_v30  ;;  %v1507_v49 = vmul.f32 %v3322_v15, %v1490_v30  ;;  %v1523_v53 = vmul.f32 %v3327_v60, %v1490_v30 }
 0x3c0   :  { %v1465_v62 = vmul.f32 %v2008_v59, %v1464_v14 }
 0x3c1   :  { %1617 = vst.msk [vmem:[%s3424_s6 + $0x68] sm:$0xff] %vm61_vm0, %v1601_v18  ;;  %v1539_v22 = vmul.f32 %v1491_v50, %v3630_v6  ;;  %v1555_v57 = vmul.f32 %v1507_v49, %v3632_v32  ;;  %v1636_v38 = vsel %vm1620_vm3, %v1491_v50, %v1507_v49  ;;  %v1587_v36 = vmul.f32 %v1523_v53, %v3634_v45 }
 0x3c2   :  { %v1653_v15 = vsel %vm1637_vm4, %v1636_v38, %v1523_v53  ;;  %v1466_v48 = vadd.f32 %v2008_v59, %v1465_v62 }
 0x3c3   :  { %v1571_v60 = vadd.f32 %v1555_v57, %v1539_v22  ;;  %1670 = vst.msk [vmem:[%s3425_s7 + $0x78] sm:$0xff] %vm1654_vm8, %v1653_v15 }
 0x3c4   :  { %v1470_v16 = vsel %vm1469_vm6, %v2008_v59, %v1466_v48 }
 0x3c5   :  { %v1603_v34 = vadd.f32 %v1587_v36, %v1571_v60  ;;  %v1475_v19 = vsel %vm1472_vm7, %v1474_v24, %v1470_v16 }
 0x3c6   :  { %v1476_v20 = vmul.f32 %v3340_v2, %v1475_v19  ;;  %v1506_v40 = vmul.f32 %v3350_v17, %v1475_v19  ;;  %v1522_v39 = vmul.f32 %v3354_v46, %v1475_v19  ;;  %v3640_v17 = vmax.f32 %v3639_v28, 0.0 }
 0x3c7   :  { %1619 = vst.msk [vmem:[%s3424_s6 + $0x78] sm:$0xff] %vm61_vm0, %v1603_v34 }
 0x3c8   :  { %v1538_v33 = vmul.f32 %v1476_v20, %v3636_v11  ;;  %v1554_v54 = vmul.f32 %v1506_v40, %v3638_v42  ;;  %v1635_v47 = vsel %vm1620_vm3, %v1476_v20, %v1506_v40  ;;  %v1586_v31 = vmul.f32 %v1522_v39, %v3640_v17 }
 0x3c9   :  { %v1652_v52 = vsel %vm1637_vm4, %v1635_v47, %v1522_v39 }
 0x3ca   :  { %v1570_v2 = vadd.f32 %v1554_v54, %v1538_v33  ;;  %1669 = vst.msk [vmem:[%s3425_s7 + $0x70] sm:$0xff] %vm1654_vm8, %v1652_v52 }
 0x3cc   :  { %v1602_v46 = vadd.f32 %v1586_v31, %v1570_v2 }
 0x3ce   :  { %1618 = vst.msk [vmem:[%s3424_s6 + $0x70] sm:$0xff] %vm61_vm0, %v1602_v46 }
 0x3cf   :  { %1679 = vsyncpa [#allocation3], 1 }

</bundles_post_ra>
